<compile_context>
chip_gen: v7x
topology: tpu7x:2x2x1
jax: 0.10.0
libtpu: 0.0.40
codegen_flags: <defaults>
</compile_context>

<pallas_src>
import functools
import numpy as np

import jax
import jax.numpy as jnp
from jax.experimental import pallas as pl
from jax.experimental.pallas import tpu as pltpu

GROUPS = 2          # nn.GroupNorm(2, C_out)
EPS = 1e-5          # GroupNorm default eps


def _convsc_kernel(idx_ref, x_ref, w_ref, prm_ref, o_ref, *,
                   K, pad, H, W, HW, NB, groups, eps, precision):
    """One grid step = NB samples, batch folded into the lane axis.

    idx_ref : (2, NB*HW) int32   row 0 = h index, row 1 = w index (per lane, periodic in HW)
    x_ref   : (Cin, NB*HW)       matmul dtype (bf16 or f32)
    w_ref   : (K*K, Cout, Cin)   matmul dtype, tap index t = dy*K + dx
    prm_ref : (Cout, 3) f32      [:,0]=conv bias, [:,1]=gamma, [:,2]=beta
    o_ref   : (Cout, NB*HW)      output dtype (bf16 or f32), lane-dense stores
    """
    c_out = o_ref.shape[0]
    cg = c_out // groups

    x = x_ref[...]                         # (Cin, NB*HW), read once
    idx = idx_ref[...]
    h_idx = idx[0:1, :]                    # (1, NB*HW)
    w_idx = idx[1:2, :]
    nbhw = x.shape[1]

    # ---- Conv as K*K shifted matmuls (im2col built in VMEM, not HBM) -------------
    # For tap (dy, dx): shift the flattened image by s = (dy-pad)*W + (dx-pad) along the
    # lane axis (pltpu.roll, XLU) and zero the positions whose source falls outside the
    # image (this also kills every cross-sample / row-wrap artifact of the roll).
    acc = jnp.zeros((c_out, nbhw), jnp.float32)
    for dy in range(K):
        for dx in range(K):
            sh, sw = dy - pad, dx - pad
            s = sh * W + sw
            xs = pltpu.roll(x, (-s) % nbhw, 1) if s != 0 else x
            conds = []
            if sh < 0:
                conds.append(h_idx >= -sh)
            if sh > 0:
                conds.append(h_idx < H - sh)
            if sw < 0:
                conds.append(w_idx >= -sw)
            if sw > 0:
                conds.append(w_idx < W - sw)
            if conds:
                valid = functools.reduce(lambda a, b: a & b, conds)
                xs = jnp.where(valid, xs, 0)
            acc = acc + jnp.dot(w_ref[dy * K + dx], xs,
                                preferred_element_type=jnp.float32,
                                precision=precision)

    bias = prm_ref[:, 0:1]
    gamma = prm_ref[:, 1:2]
    beta = prm_ref[:, 2:3]
    y = acc + bias                          # (Cout, NB*HW) f32

    # ---- GroupNorm(groups) + SiLU, per sample over 128-aligned lane chunks -------
    # Lane reduction first (f32, VPU/XLU), then a tiny masked within-group sublane
    # reduce broadcast back to every channel of the group (no MXU, no bf16 truncation).
    ch = jax.lax.broadcasted_iota(jnp.int32, (c_out, 1), 0)
    gmasks = [(ch >= g * cg) & (ch < (g + 1) * cg) for g in range(groups)]
    inv_cnt = 1.0 / (cg * HW)

    for n in range(NB):                     # NB is small (capped at 8)
        y_n = y[:, n * HW:(n + 1) * HW]
        sum_c = jnp.sum(y_n, axis=-1, keepdims=True)          # (Cout, 1)
        mean_c = jnp.zeros_like(sum_c)
        for g in range(groups):
            gsum = jnp.sum(jnp.where(gmasks[g], sum_c, 0.0), keepdims=True)   # (1, 1)
            mean_c = jnp.where(gmasks[g], gsum, mean_c)
        mean_c = mean_c * inv_cnt

        d = y_n - mean_c
        ss_c = jnp.sum(d * d, axis=-1, keepdims=True)          # (Cout, 1), two-pass var
        var_c = jnp.zeros_like(ss_c)
        for g in range(groups):
            gsum = jnp.sum(jnp.where(gmasks[g], ss_c, 0.0), keepdims=True)
            var_c = jnp.where(gmasks[g], gsum, var_c)
        var_c = var_c * inv_cnt

        z = d * jax.lax.rsqrt(var_c + eps) * gamma + beta
        # SiLU (sigmoid's exp runs on the EUP slot); cast only at the store.
        o_ref[:, n * HW:(n + 1) * HW] = (z * jax.nn.sigmoid(z)).astype(o_ref.dtype)


@functools.partial(jax.jit, static_argnames=("kernel_size", "matmul_dtype", "out_dtype"))
def convsc_forward(x_nchw, w_oihw, bias, gamma, beta, *, kernel_size=3,
                   matmul_dtype=jnp.bfloat16, out_dtype=jnp.bfloat16):
    """ConvSC forward (default config: stride=1, act_norm=True): (N,Cin,H,W)->(N,Cout,H,W).

    TODO(synk): downsampling=True (stride 2) and upsampling=True (Conv2d->PixelShuffle)
    branches of BasicConv2d are not implemented (the roll-based folded im2col assumes stride 1).
    """
    N, Cin, H, W = x_nchw.shape
    Cout = w_oihw.shape[0]
    K = kernel_size
    stride = 1
    pad = (K - stride + 1) // 2            # ConvSC padding rule
    HW = H * W

    mm_b = jnp.dtype(matmul_dtype).itemsize
    out_b = jnp.dtype(out_dtype).itemsize

    # Samples per grid step: largest divisor of N whose double-buffered block footprint
    # fits a ~6 MiB budget (safe on v7x's 64 MiB-per-TC VMEM as well as v5e/v6e), while
    # keeping grid length >= 2 when N >= 2 so both v7x TensorCores get work.
    if HW % 128 == 0:
        per_sample = HW * (2 * Cin * mm_b        # input block (double-buffered)
                           + 2 * Cout * out_b    # output block (double-buffered)
                           + Cout * 4            # live f32 accumulator
                           + 2 * Cin * mm_b      # rolled/masked tap temporaries
                           + 4 * 4)              # idx vectors + slack
        budget = 6 << 20
        NB = 1
        for d in range(1, min(N, 8) + 1):
            if N % d != 0:
                continue
            if N >= 2 and (N // d) < 2:
                continue
            if d * per_sample <= budget:
                NB = d
    else:
        # TODO(synk): pad H*W up to a multiple of 128 (lane-dense stores) and mask the pad
        # lanes out of the GroupNorm stats; for now fall back to one full-extent block.
        NB = N
    grid = (N // NB,)

    # Channel-major input slab (Cin, N*HW): the transpose fuses with the dtype cast into a
    # single pass over the input; the kernel then reads the image exactly once (no im2col).
    x_cm = jnp.transpose(x_nchw, (1, 0, 2, 3)).reshape(Cin, N * HW).astype(matmul_dtype)
    # PyTorch OIHW -> (K*K, Cout, Cin), tap index t = dy*K + dx.
    w_kk = jnp.transpose(w_oihw, (2, 3, 0, 1)).reshape(K * K, Cout, Cin).astype(matmul_dtype)
    # bias / gamma / beta merged into one small block -> a single tiny DMA.
    prm = jnp.stack([bias, gamma, beta], axis=1).astype(jnp.float32)       # (Cout, 3)

    # Per-lane (h, w) indices for the boundary masks (periodic in HW -> same for every block;
    # avoids integer div/mod inside the kernel).
    pos = np.arange(NB * HW, dtype=np.int64) % HW
    idx = jnp.asarray(np.stack([pos // W, pos % W]).astype(np.int32))      # (2, NB*HW)

    precision = (jax.lax.Precision.HIGHEST
                 if jnp.dtype(matmul_dtype) == jnp.dtype(jnp.float32) else None)
    kern = functools.partial(_convsc_kernel, K=K, pad=pad, H=H, W=W, HW=HW, NB=NB,
                             groups=GROUPS, eps=EPS, precision=precision)

    out_flat = pl.pallas_call(
        kern,
        out_shape=jax.ShapeDtypeStruct((Cout, N * HW), out_dtype),
        grid_spec=pltpu.PrefetchScalarGridSpec(
            num_scalar_prefetch=0,
            grid=grid,
            in_specs=[
                pl.BlockSpec((2, NB * HW), lambda i: (0, 0)),              # h/w indices
                pl.BlockSpec((Cin, NB * HW), lambda i: (0, i)),            # image slab
                pl.BlockSpec((K * K, Cout, Cin), lambda i: (0, 0, 0)),     # weights (resident)
                pl.BlockSpec((Cout, 3), lambda i: (0, 0)),                 # bias/gamma/beta
            ],
            out_specs=pl.BlockSpec((Cout, NB * HW), lambda i: (0, i)),
        ),
        compiler_params=pltpu.CompilerParams(
            dimension_semantics=("parallel",),
            vmem_limit_bytes=32 * 1024 * 1024),
    )(idx, x_cm, w_kk, prm)

    # (Cout, N*HW) -> (N, Cout, H, W): one cheap pass over the (bf16) output.
    return jnp.transpose(out_flat.reshape(Cout, N, H, W), (1, 0, 2, 3))


def reference(x, w, b, gamma, beta, K=3):
    """Pure-JAX f32 reference (Conv2d s=1 p=K//2 -> GroupNorm(2) -> SiLU)."""
    pad = (K - 1 + 1) // 2
    y = jax.lax.conv_general_dilated(
        x, w, (1, 1), [(pad, pad), (pad, pad)],
        dimension_numbers=("NCHW", "OIHW", "NCHW"))
    y = y + b.reshape(1, -1, 1, 1)
    N, C, H, W = y.shape
    yg = y.reshape(N, GROUPS, C // GROUPS, H, W)
    mean = yg.mean(axis=(2, 3, 4), keepdims=True)
    var = ((yg - mean) ** 2).mean(axis=(2, 3, 4), keepdims=True)
    yn = ((yg - mean) / jnp.sqrt(var + EPS)).reshape(N, C, H, W)
    yn = yn * gamma.reshape(1, -1, 1, 1) + beta.reshape(1, -1, 1, 1)
    return yn * jax.nn.sigmoid(yn)


if __name__ == "__main__":
    # ConvSC(C_in=4, C_out=8): kernel_size=3, downsampling=False -> stride=1, padding=1.
    N, Cin, Cout, H, W, K = 2, 4, 8, 16, 16, 3

    key = jax.random.PRNGKey(0)
    kx, kw = jax.random.split(key)
    x = jax.random.normal(kx, (N, Cin, H, W), dtype=jnp.float32)
    # Conv weight ~ trunc_normal_(std=0.02), bias = 0; GroupNorm affine defaults.
    w = 0.02 * jax.random.truncated_normal(kw, -2.0, 2.0, (Cout, Cin, K, K), dtype=jnp.float32)
    b = jnp.zeros((Cout,), jnp.float32)
    gamma = jnp.ones((Cout,), jnp.float32)
    beta = jnp.zeros((Cout,), jnp.float32)

    ref = reference(x, w, b, gamma, beta, K=K)

    # Exact-path check: f32 operands with HIGHEST matmul precision, f32 output.
    out_f32 = convsc_forward(x, w, b, gamma, beta, kernel_size=K,
                             matmul_dtype=jnp.float32, out_dtype=jnp.float32)
    out_f32 = jax.block_until_ready(out_f32)
    assert out_f32.shape == (N, Cout, H, W), out_f32.shape
    assert jnp.allclose(out_f32, ref, atol=1e-4, rtol=1e-4), \
        float(jnp.max(jnp.abs(out_f32 - ref)))

    # Production path (all generations): bf16 matmul operands, f32 accumulation/stats,
    # bf16 output writeback.
    out_bf16 = convsc_forward(x, w, b, gamma, beta, kernel_size=K,
                              matmul_dtype=jnp.bfloat16, out_dtype=jnp.bfloat16)
    out_bf16 = jax.block_until_ready(out_bf16)
    assert out_bf16.shape == (N, Cout, H, W), out_bf16.shape
    assert out_bf16.dtype == jnp.bfloat16, out_bf16.dtype
    assert jnp.allclose(out_bf16.astype(jnp.float32), ref, atol=5e-2, rtol=5e-2), \
        float(jnp.max(jnp.abs(out_bf16.astype(jnp.float32) - ref)))

    print("KERNEL_OK")
</pallas_src>

<mosaic_0001>
module attributes {stable_mosaic.version = 11 : i64} {
  func.func @_convsc_kernel(%arg0: i32, %arg1: memref<2x256xi32, #tpu.memory_space<vmem>>, %arg2: memref<4x256xf32, #tpu.memory_space<vmem>>, %arg3: memref<9x8x4xf32, #tpu.memory_space<vmem>>, %arg4: memref<8x3xf32, #tpu.memory_space<vmem>>, %arg5: memref<8x256xf32, #tpu.memory_space<vmem>>) attributes {dimension_semantics = [#tpu.dimension_semantics<parallel>], iteration_bounds = array<i64: 2>, scalar_prefetch = 0 : i64, scratch_operands = 0 : i64, tpu.core_type = #tpu.core_type<tc>, window_params = [{pipeline_mode = #tpu.pipeline_mode<synchronous>, transform_indices = @transform_0, window_bounds = array<i64: 2, 256>}, {transform_indices = @transform_1, window_bounds = array<i64: 4, 256>}, {pipeline_mode = #tpu.pipeline_mode<synchronous>, transform_indices = @transform_2, window_bounds = array<i64: 9, 8, 4>}, {pipeline_mode = #tpu.pipeline_mode<synchronous>, transform_indices = @transform_3, window_bounds = array<i64: 8, 3>}, {transform_indices = @transform_4, window_bounds = array<i64: 8, 256>}]} {
    %c0 = arith.constant 0 : index
    %c0_0 = arith.constant 0 : index
    %0 = vector.load %arg2[%c0, %c0_0] : memref<4x256xf32, #tpu.memory_space<vmem>>, vector<4x256xf32>
    %c0_1 = arith.constant 0 : index
    %c0_2 = arith.constant 0 : index
    %1 = vector.load %arg1[%c0_1, %c0_2] : memref<2x256xi32, #tpu.memory_space<vmem>>, vector<2x256xi32>
    %2 = vector.extract_strided_slice %1 {offsets = [0, 0], sizes = [1, 256], strides = [1, 1]} : vector<2x256xi32> to vector<1x256xi32>
    %3 = vector.extract_strided_slice %1 {offsets = [1, 0], sizes = [1, 256], strides = [1, 1]} : vector<2x256xi32> to vector<1x256xi32>
    %cst = arith.constant 0.000000e+00 : f32
    %4 = vector.broadcast %cst : f32 to vector<8x256xf32>
    %c17_i32 = arith.constant 17 : i32
    %5 = tpu.dynamic_rotate %0 by %c17_i32 dim 1 : vector<4x256xf32>, i32 -> vector<4x256xf32>
    %c1_i32 = arith.constant 1 : i32
    %6 = vector.broadcast %c1_i32 : i32 to vector<1x256xi32>
    %7 = arith.cmpi sge, %2, %6 : vector<1x256xi32>
    %c1_i32_3 = arith.constant 1 : i32
    %8 = vector.broadcast %c1_i32_3 : i32 to vector<1x256xi32>
    %9 = arith.cmpi sge, %3, %8 : vector<1x256xi32>
    %10 = arith.andi %7, %9 : vector<1x256xi1>
    %c0_i32 = arith.constant 0 : i32
    %11 = arith.sitofp %c0_i32 : i32 to f32
    %12 = vector.shape_cast %10 : vector<1x256xi1> to vector<1x256xi1>
    %13 = vector.broadcast %12 : vector<1x256xi1> to vector<4x256xi1>
    %14 = vector.broadcast %11 : f32 to vector<4x256xf32>
    %15 = arith.select %13, %5, %14 : vector<4x256xi1>, vector<4x256xf32>
    %c0_4 = arith.constant 0 : index
    %c0_5 = arith.constant 0 : index
    %c0_6 = arith.constant 0 : index
    %16 = vector.load %arg3[%c0_4, %c0_5, %c0_6] : memref<9x8x4xf32, #tpu.memory_space<vmem>>, vector<1x8x4xf32>
    %17 = vector.shape_cast %16 : vector<1x8x4xf32> to vector<8x4xf32>
    %cst_7 = arith.constant dense<0.000000e+00> : vector<8x256xf32>
    %18 = tpu.matmul %17, %15, %cst_7 {dimension_numbers = #tpu.dot_dimension_numbers<[1], [0], [0], [1], [0, 0, 1, 1], [], []>, precision = #tpu.contract_precision<fp32>} : vector<8x4xf32>, vector<4x256xf32>, vector<8x256xf32> -> vector<8x256xf32>
    %19 = arith.addf %4, %18 : vector<8x256xf32>
    %c16_i32 = arith.constant 16 : i32
    %20 = tpu.dynamic_rotate %0 by %c16_i32 dim 1 : vector<4x256xf32>, i32 -> vector<4x256xf32>
    %c1_i32_8 = arith.constant 1 : i32
    %21 = vector.broadcast %c1_i32_8 : i32 to vector<1x256xi32>
    %22 = arith.cmpi sge, %2, %21 : vector<1x256xi32>
    %c0_i32_9 = arith.constant 0 : i32
    %23 = arith.sitofp %c0_i32_9 : i32 to f32
    %24 = vector.shape_cast %22 : vector<1x256xi1> to vector<1x256xi1>
    %25 = vector.broadcast %24 : vector<1x256xi1> to vector<4x256xi1>
    %26 = vector.broadcast %23 : f32 to vector<4x256xf32>
    %27 = arith.select %25, %20, %26 : vector<4x256xi1>, vector<4x256xf32>
    %c1 = arith.constant 1 : index
    %c0_10 = arith.constant 0 : index
    %c0_11 = arith.constant 0 : index
    %28 = vector.load %arg3[%c1, %c0_10, %c0_11] : memref<9x8x4xf32, #tpu.memory_space<vmem>>, vector<1x8x4xf32>
    %29 = vector.shape_cast %28 : vector<1x8x4xf32> to vector<8x4xf32>
    %cst_12 = arith.constant dense<0.000000e+00> : vector<8x256xf32>
    %30 = tpu.matmul %29, %27, %cst_12 {dimension_numbers = #tpu.dot_dimension_numbers<[1], [0], [0], [1], [0, 0, 1, 1], [], []>, precision = #tpu.contract_precision<fp32>} : vector<8x4xf32>, vector<4x256xf32>, vector<8x256xf32> -> vector<8x256xf32>
    %31 = arith.addf %19, %30 : vector<8x256xf32>
    %c15_i32 = arith.constant 15 : i32
    %32 = tpu.dynamic_rotate %0 by %c15_i32 dim 1 : vector<4x256xf32>, i32 -> vector<4x256xf32>
    %c1_i32_13 = arith.constant 1 : i32
    %33 = vector.broadcast %c1_i32_13 : i32 to vector<1x256xi32>
    %34 = arith.cmpi sge, %2, %33 : vector<1x256xi32>
    %c15_i32_14 = arith.constant 15 : i32
    %35 = vector.broadcast %c15_i32_14 : i32 to vector<1x256xi32>
    %36 = arith.cmpi slt, %3, %35 : vector<1x256xi32>
    %37 = arith.andi %34, %36 : vector<1x256xi1>
    %c0_i32_15 = arith.constant 0 : i32
    %38 = arith.sitofp %c0_i32_15 : i32 to f32
    %39 = vector.shape_cast %37 : vector<1x256xi1> to vector<1x256xi1>
    %40 = vector.broadcast %39 : vector<1x256xi1> to vector<4x256xi1>
    %41 = vector.broadcast %38 : f32 to vector<4x256xf32>
    %42 = arith.select %40, %32, %41 : vector<4x256xi1>, vector<4x256xf32>
    %c2 = arith.constant 2 : index
    %c0_16 = arith.constant 0 : index
    %c0_17 = arith.constant 0 : index
    %43 = vector.load %arg3[%c2, %c0_16, %c0_17] : memref<9x8x4xf32, #tpu.memory_space<vmem>>, vector<1x8x4xf32>
    %44 = vector.shape_cast %43 : vector<1x8x4xf32> to vector<8x4xf32>
    %cst_18 = arith.constant dense<0.000000e+00> : vector<8x256xf32>
    %45 = tpu.matmul %44, %42, %cst_18 {dimension_numbers = #tpu.dot_dimension_numbers<[1], [0], [0], [1], [0, 0, 1, 1], [], []>, precision = #tpu.contract_precision<fp32>} : vector<8x4xf32>, vector<4x256xf32>, vector<8x256xf32> -> vector<8x256xf32>
    %46 = arith.addf %31, %45 : vector<8x256xf32>
    %c1_i32_19 = arith.constant 1 : i32
    %47 = tpu.dynamic_rotate %0 by %c1_i32_19 dim 1 : vector<4x256xf32>, i32 -> vector<4x256xf32>
    %c1_i32_20 = arith.constant 1 : i32
    %48 = vector.broadcast %c1_i32_20 : i32 to vector<1x256xi32>
    %49 = arith.cmpi sge, %3, %48 : vector<1x256xi32>
    %c0_i32_21 = arith.constant 0 : i32
    %50 = arith.sitofp %c0_i32_21 : i32 to f32
    %51 = vector.shape_cast %49 : vector<1x256xi1> to vector<1x256xi1>
    %52 = vector.broadcast %51 : vector<1x256xi1> to vector<4x256xi1>
    %53 = vector.broadcast %50 : f32 to vector<4x256xf32>
    %54 = arith.select %52, %47, %53 : vector<4x256xi1>, vector<4x256xf32>
    %c3 = arith.constant 3 : index
    %c0_22 = arith.constant 0 : index
    %c0_23 = arith.constant 0 : index
    %55 = vector.load %arg3[%c3, %c0_22, %c0_23] : memref<9x8x4xf32, #tpu.memory_space<vmem>>, vector<1x8x4xf32>
    %56 = vector.shape_cast %55 : vector<1x8x4xf32> to vector<8x4xf32>
    %cst_24 = arith.constant dense<0.000000e+00> : vector<8x256xf32>
    %57 = tpu.matmul %56, %54, %cst_24 {dimension_numbers = #tpu.dot_dimension_numbers<[1], [0], [0], [1], [0, 0, 1, 1], [], []>, precision = #tpu.contract_precision<fp32>} : vector<8x4xf32>, vector<4x256xf32>, vector<8x256xf32> -> vector<8x256xf32>
    %58 = arith.addf %46, %57 : vector<8x256xf32>
    %c4 = arith.constant 4 : index
    %c0_25 = arith.constant 0 : index
    %c0_26 = arith.constant 0 : index
    %59 = vector.load %arg3[%c4, %c0_25, %c0_26] : memref<9x8x4xf32, #tpu.memory_space<vmem>>, vector<1x8x4xf32>
    %60 = vector.shape_cast %59 : vector<1x8x4xf32> to vector<8x4xf32>
    %cst_27 = arith.constant dense<0.000000e+00> : vector<8x256xf32>
    %61 = tpu.matmul %60, %0, %cst_27 {dimension_numbers = #tpu.dot_dimension_numbers<[1], [0], [0], [1], [0, 0, 1, 1], [], []>, precision = #tpu.contract_precision<fp32>} : vector<8x4xf32>, vector<4x256xf32>, vector<8x256xf32> -> vector<8x256xf32>
    %62 = arith.addf %58, %61 : vector<8x256xf32>
    %c255_i32 = arith.constant 255 : i32
    %63 = tpu.dynamic_rotate %0 by %c255_i32 dim 1 : vector<4x256xf32>, i32 -> vector<4x256xf32>
    %c15_i32_28 = arith.constant 15 : i32
    %64 = vector.broadcast %c15_i32_28 : i32 to vector<1x256xi32>
    %65 = arith.cmpi slt, %3, %64 : vector<1x256xi32>
    %c0_i32_29 = arith.constant 0 : i32
    %66 = arith.sitofp %c0_i32_29 : i32 to f32
    %67 = vector.shape_cast %65 : vector<1x256xi1> to vector<1x256xi1>
    %68 = vector.broadcast %67 : vector<1x256xi1> to vector<4x256xi1>
    %69 = vector.broadcast %66 : f32 to vector<4x256xf32>
    %70 = arith.select %68, %63, %69 : vector<4x256xi1>, vector<4x256xf32>
    %c5 = arith.constant 5 : index
    %c0_30 = arith.constant 0 : index
    %c0_31 = arith.constant 0 : index
    %71 = vector.load %arg3[%c5, %c0_30, %c0_31] : memref<9x8x4xf32, #tpu.memory_space<vmem>>, vector<1x8x4xf32>
    %72 = vector.shape_cast %71 : vector<1x8x4xf32> to vector<8x4xf32>
    %cst_32 = arith.constant dense<0.000000e+00> : vector<8x256xf32>
    %73 = tpu.matmul %72, %70, %cst_32 {dimension_numbers = #tpu.dot_dimension_numbers<[1], [0], [0], [1], [0, 0, 1, 1], [], []>, precision = #tpu.contract_precision<fp32>} : vector<8x4xf32>, vector<4x256xf32>, vector<8x256xf32> -> vector<8x256xf32>
    %74 = arith.addf %62, %73 : vector<8x256xf32>
    %c241_i32 = arith.constant 241 : i32
    %75 = tpu.dynamic_rotate %0 by %c241_i32 dim 1 : vector<4x256xf32>, i32 -> vector<4x256xf32>
    %c15_i32_33 = arith.constant 15 : i32
    %76 = vector.broadcast %c15_i32_33 : i32 to vector<1x256xi32>
    %77 = arith.cmpi slt, %2, %76 : vector<1x256xi32>
    %c1_i32_34 = arith.constant 1 : i32
    %78 = vector.broadcast %c1_i32_34 : i32 to vector<1x256xi32>
    %79 = arith.cmpi sge, %3, %78 : vector<1x256xi32>
    %80 = arith.andi %77, %79 : vector<1x256xi1>
    %c0_i32_35 = arith.constant 0 : i32
    %81 = arith.sitofp %c0_i32_35 : i32 to f32
    %82 = vector.shape_cast %80 : vector<1x256xi1> to vector<1x256xi1>
    %83 = vector.broadcast %82 : vector<1x256xi1> to vector<4x256xi1>
    %84 = vector.broadcast %81 : f32 to vector<4x256xf32>
    %85 = arith.select %83, %75, %84 : vector<4x256xi1>, vector<4x256xf32>
    %c6 = arith.constant 6 : index
    %c0_36 = arith.constant 0 : index
    %c0_37 = arith.constant 0 : index
    %86 = vector.load %arg3[%c6, %c0_36, %c0_37] : memref<9x8x4xf32, #tpu.memory_space<vmem>>, vector<1x8x4xf32>
    %87 = vector.shape_cast %86 : vector<1x8x4xf32> to vector<8x4xf32>
    %cst_38 = arith.constant dense<0.000000e+00> : vector<8x256xf32>
    %88 = tpu.matmul %87, %85, %cst_38 {dimension_numbers = #tpu.dot_dimension_numbers<[1], [0], [0], [1], [0, 0, 1, 1], [], []>, precision = #tpu.contract_precision<fp32>} : vector<8x4xf32>, vector<4x256xf32>, vector<8x256xf32> -> vector<8x256xf32>
    %89 = arith.addf %74, %88 : vector<8x256xf32>
    %c240_i32 = arith.constant 240 : i32
    %90 = tpu.dynamic_rotate %0 by %c240_i32 dim 1 : vector<4x256xf32>, i32 -> vector<4x256xf32>
    %c15_i32_39 = arith.constant 15 : i32
    %91 = vector.broadcast %c15_i32_39 : i32 to vector<1x256xi32>
    %92 = arith.cmpi slt, %2, %91 : vector<1x256xi32>
    %c0_i32_40 = arith.constant 0 : i32
    %93 = arith.sitofp %c0_i32_40 : i32 to f32
    %94 = vector.shape_cast %92 : vector<1x256xi1> to vector<1x256xi1>
    %95 = vector.broadcast %94 : vector<1x256xi1> to vector<4x256xi1>
    %96 = vector.broadcast %93 : f32 to vector<4x256xf32>
    %97 = arith.select %95, %90, %96 : vector<4x256xi1>, vector<4x256xf32>
    %c7 = arith.constant 7 : index
    %c0_41 = arith.constant 0 : index
    %c0_42 = arith.constant 0 : index
    %98 = vector.load %arg3[%c7, %c0_41, %c0_42] : memref<9x8x4xf32, #tpu.memory_space<vmem>>, vector<1x8x4xf32>
    %99 = vector.shape_cast %98 : vector<1x8x4xf32> to vector<8x4xf32>
    %cst_43 = arith.constant dense<0.000000e+00> : vector<8x256xf32>
    %100 = tpu.matmul %99, %97, %cst_43 {dimension_numbers = #tpu.dot_dimension_numbers<[1], [0], [0], [1], [0, 0, 1, 1], [], []>, precision = #tpu.contract_precision<fp32>} : vector<8x4xf32>, vector<4x256xf32>, vector<8x256xf32> -> vector<8x256xf32>
    %101 = arith.addf %89, %100 : vector<8x256xf32>
    %c239_i32 = arith.constant 239 : i32
    %102 = tpu.dynamic_rotate %0 by %c239_i32 dim 1 : vector<4x256xf32>, i32 -> vector<4x256xf32>
    %c15_i32_44 = arith.constant 15 : i32
    %103 = vector.broadcast %c15_i32_44 : i32 to vector<1x256xi32>
    %104 = arith.cmpi slt, %2, %103 : vector<1x256xi32>
    %c15_i32_45 = arith.constant 15 : i32
    %105 = vector.broadcast %c15_i32_45 : i32 to vector<1x256xi32>
    %106 = arith.cmpi slt, %3, %105 : vector<1x256xi32>
    %107 = arith.andi %104, %106 : vector<1x256xi1>
    %c0_i32_46 = arith.constant 0 : i32
    %108 = arith.sitofp %c0_i32_46 : i32 to f32
    %109 = vector.shape_cast %107 : vector<1x256xi1> to vector<1x256xi1>
    %110 = vector.broadcast %109 : vector<1x256xi1> to vector<4x256xi1>
    %111 = vector.broadcast %108 : f32 to vector<4x256xf32>
    %112 = arith.select %110, %102, %111 : vector<4x256xi1>, vector<4x256xf32>
    %c8 = arith.constant 8 : index
    %c0_47 = arith.constant 0 : index
    %c0_48 = arith.constant 0 : index
    %113 = vector.load %arg3[%c8, %c0_47, %c0_48] : memref<9x8x4xf32, #tpu.memory_space<vmem>>, vector<1x8x4xf32>
    %114 = vector.shape_cast %113 : vector<1x8x4xf32> to vector<8x4xf32>
    %cst_49 = arith.constant dense<0.000000e+00> : vector<8x256xf32>
    %115 = tpu.matmul %114, %112, %cst_49 {dimension_numbers = #tpu.dot_dimension_numbers<[1], [0], [0], [1], [0, 0, 1, 1], [], []>, precision = #tpu.contract_precision<fp32>} : vector<8x4xf32>, vector<4x256xf32>, vector<8x256xf32> -> vector<8x256xf32>
    %116 = arith.addf %101, %115 : vector<8x256xf32>
    %c0_50 = arith.constant 0 : index
    %c0_51 = arith.constant 0 : index
    %117 = vector.load %arg4[%c0_50, %c0_51] : memref<8x3xf32, #tpu.memory_space<vmem>>, vector<8x1xf32>
    %c0_52 = arith.constant 0 : index
    %c1_53 = arith.constant 1 : index
    %118 = vector.load %arg4[%c0_52, %c1_53] : memref<8x3xf32, #tpu.memory_space<vmem>>, vector<8x1xf32>
    %c0_54 = arith.constant 0 : index
    %c2_55 = arith.constant 2 : index
    %119 = vector.load %arg4[%c0_54, %c2_55] : memref<8x3xf32, #tpu.memory_space<vmem>>, vector<8x1xf32>
    %120 = vector.broadcast %117 : vector<8x1xf32> to vector<8x256xf32>
    %121 = arith.addf %116, %120 : vector<8x256xf32>
    %122 = tpu.iota {dimensions = array<i32: 0>} : vector<8x1xi32>
    %c0_i32_56 = arith.constant 0 : i32
    %123 = vector.broadcast %c0_i32_56 : i32 to vector<8x1xi32>
    %124 = arith.cmpi sge, %122, %123 : vector<8x1xi32>
    %c4_i32 = arith.constant 4 : i32
    %125 = vector.broadcast %c4_i32 : i32 to vector<8x1xi32>
    %126 = arith.cmpi slt, %122, %125 : vector<8x1xi32>
    %127 = arith.andi %124, %126 : vector<8x1xi1>
    %c4_i32_57 = arith.constant 4 : i32
    %128 = vector.broadcast %c4_i32_57 : i32 to vector<8x1xi32>
    %129 = arith.cmpi sge, %122, %128 : vector<8x1xi32>
    %c8_i32 = arith.constant 8 : i32
    %130 = vector.broadcast %c8_i32 : i32 to vector<8x1xi32>
    %131 = arith.cmpi slt, %122, %130 : vector<8x1xi32>
    %132 = arith.andi %129, %131 : vector<8x1xi1>
    %cst_58 = arith.constant dense<0.000000e+00> : vector<8xf32>
    %133 = vector.multi_reduction <add>, %121, %cst_58 [1] : vector<8x256xf32> to vector<8xf32>
    %134 = vector.shape_cast %133 : vector<8xf32> to vector<8x1xf32>
    %cst_59 = arith.constant 0.000000e+00 : f32
    %135 = vector.broadcast %cst_59 : f32 to vector<8x1xf32>
    %cst_60 = arith.constant 0.000000e+00 : f32
    %136 = vector.broadcast %cst_60 : f32 to vector<8x1xf32>
    %137 = arith.select %127, %134, %136 : vector<8x1xi1>, vector<8x1xf32>
    %138 = vector.shape_cast %137 : vector<8x1xf32> to vector<1x8x1xf32>
    %cst_61 = arith.constant dense<0.000000e+00> : vector<1xf32>
    %139 = vector.multi_reduction <add>, %138, %cst_61 [1, 2] : vector<1x8x1xf32> to vector<1xf32>
    %140 = vector.shape_cast %139 : vector<1xf32> to vector<1x1x1xf32>
    %141 = vector.extract %140[0, 0, 0] : f32 from vector<1x1x1xf32>
    %142 = vector.broadcast %141 : f32 to vector<1x1xf32>
    %143 = vector.shape_cast %142 : vector<1x1xf32> to vector<1x1xf32>
    %144 = vector.broadcast %143 : vector<1x1xf32> to vector<8x1xf32>
    %145 = arith.select %127, %144, %135 : vector<8x1xi1>, vector<8x1xf32>
    %cst_62 = arith.constant 0.000000e+00 : f32
    %146 = vector.broadcast %cst_62 : f32 to vector<8x1xf32>
    %147 = arith.select %132, %134, %146 : vector<8x1xi1>, vector<8x1xf32>
    %148 = vector.shape_cast %147 : vector<8x1xf32> to vector<1x8x1xf32>
    %cst_63 = arith.constant dense<0.000000e+00> : vector<1xf32>
    %149 = vector.multi_reduction <add>, %148, %cst_63 [1, 2] : vector<1x8x1xf32> to vector<1xf32>
    %150 = vector.shape_cast %149 : vector<1xf32> to vector<1x1x1xf32>
    %151 = vector.extract %150[0, 0, 0] : f32 from vector<1x1x1xf32>
    %152 = vector.broadcast %151 : f32 to vector<1x1xf32>
    %153 = vector.shape_cast %152 : vector<1x1xf32> to vector<1x1xf32>
    %154 = vector.broadcast %153 : vector<1x1xf32> to vector<8x1xf32>
    %155 = arith.select %132, %154, %145 : vector<8x1xi1>, vector<8x1xf32>
    %cst_64 = arith.constant 9.765625E-4 : f32
    %156 = vector.broadcast %cst_64 : f32 to vector<8x1xf32>
    %157 = arith.mulf %155, %156 : vector<8x1xf32>
    %158 = vector.broadcast %157 : vector<8x1xf32> to vector<8x256xf32>
    %159 = arith.subf %121, %158 : vector<8x256xf32>
    %160 = arith.mulf %159, %159 : vector<8x256xf32>
    %cst_65 = arith.constant dense<0.000000e+00> : vector<8xf32>
    %161 = vector.multi_reduction <add>, %160, %cst_65 [1] : vector<8x256xf32> to vector<8xf32>
    %162 = vector.shape_cast %161 : vector<8xf32> to vector<8x1xf32>
    %cst_66 = arith.constant 0.000000e+00 : f32
    %163 = vector.broadcast %cst_66 : f32 to vector<8x1xf32>
    %cst_67 = arith.constant 0.000000e+00 : f32
    %164 = vector.broadcast %cst_67 : f32 to vector<8x1xf32>
    %165 = arith.select %127, %162, %164 : vector<8x1xi1>, vector<8x1xf32>
    %166 = vector.shape_cast %165 : vector<8x1xf32> to vector<1x8x1xf32>
    %cst_68 = arith.constant dense<0.000000e+00> : vector<1xf32>
    %167 = vector.multi_reduction <add>, %166, %cst_68 [1, 2] : vector<1x8x1xf32> to vector<1xf32>
    %168 = vector.shape_cast %167 : vector<1xf32> to vector<1x1x1xf32>
    %169 = vector.extract %168[0, 0, 0] : f32 from vector<1x1x1xf32>
    %170 = vector.broadcast %169 : f32 to vector<1x1xf32>
    %171 = vector.shape_cast %170 : vector<1x1xf32> to vector<1x1xf32>
    %172 = vector.broadcast %171 : vector<1x1xf32> to vector<8x1xf32>
    %173 = arith.select %127, %172, %163 : vector<8x1xi1>, vector<8x1xf32>
    %cst_69 = arith.constant 0.000000e+00 : f32
    %174 = vector.broadcast %cst_69 : f32 to vector<8x1xf32>
    %175 = arith.select %132, %162, %174 : vector<8x1xi1>, vector<8x1xf32>
    %176 = vector.shape_cast %175 : vector<8x1xf32> to vector<1x8x1xf32>
    %cst_70 = arith.constant dense<0.000000e+00> : vector<1xf32>
    %177 = vector.multi_reduction <add>, %176, %cst_70 [1, 2] : vector<1x8x1xf32> to vector<1xf32>
    %178 = vector.shape_cast %177 : vector<1xf32> to vector<1x1x1xf32>
    %179 = vector.extract %178[0, 0, 0] : f32 from vector<1x1x1xf32>
    %180 = vector.broadcast %179 : f32 to vector<1x1xf32>
    %181 = vector.shape_cast %180 : vector<1x1xf32> to vector<1x1xf32>
    %182 = vector.broadcast %181 : vector<1x1xf32> to vector<8x1xf32>
    %183 = arith.select %132, %182, %173 : vector<8x1xi1>, vector<8x1xf32>
    %cst_71 = arith.constant 9.765625E-4 : f32
    %184 = vector.broadcast %cst_71 : f32 to vector<8x1xf32>
    %185 = arith.mulf %183, %184 : vector<8x1xf32>
    %cst_72 = arith.constant 9.99999974E-6 : f32
    %186 = vector.broadcast %cst_72 : f32 to vector<8x1xf32>
    %187 = arith.addf %185, %186 : vector<8x1xf32>
    %188 = math.rsqrt %187 : vector<8x1xf32>
    %189 = vector.broadcast %188 : vector<8x1xf32> to vector<8x256xf32>
    %190 = arith.mulf %159, %189 : vector<8x256xf32>
    %191 = vector.broadcast %118 : vector<8x1xf32> to vector<8x256xf32>
    %192 = arith.mulf %190, %191 : vector<8x256xf32>
    %193 = vector.broadcast %119 : vector<8x1xf32> to vector<8x256xf32>
    %194 = arith.addf %192, %193 : vector<8x256xf32>
    %195 = arith.negf %194 : vector<8x256xf32>
    %196 = math.exp %195 : vector<8x256xf32>
    %cst_73 = arith.constant 1.000000e+00 : f32
    %197 = vector.broadcast %cst_73 : f32 to vector<8x256xf32>
    %198 = arith.addf %197, %196 : vector<8x256xf32>
    %199 = arith.divf %197, %198 : vector<8x256xf32>
    %200 = arith.mulf %194, %199 : vector<8x256xf32>
    %c0_74 = arith.constant 0 : index
    %c0_75 = arith.constant 0 : index
    %201 = vector.load %arg5[%c0_74, %c0_75] : memref<8x256xf32, #tpu.memory_space<vmem>>, vector<8x256xf32>
    tpu.vector_store %arg5[%c0_74, %c0_75], %200 {strides = array<i32>} : memref<8x256xf32, #tpu.memory_space<vmem>>, vector<8x256xf32>,
    return
  }
  func.func @transform_0(%arg0: i32) -> (i32, i32) {
    %c0_i32 = arith.constant 0 : i32
    %c0_i32_0 = arith.constant 0 : i32
    %c0_i32_1 = arith.constant 0 : i32
    return %c0_i32, %c0_i32_0 : i32, i32
  }
  func.func @transform_1(%arg0: i32) -> (i32, i32) {
    %c0_i32 = arith.constant 0 : i32
    %c0_i32_0 = arith.constant 0 : i32
    return %c0_i32, %arg0 : i32, i32
  }
  func.func @transform_2(%arg0: i32) -> (i32, i32, i32) {
    %c0_i32 = arith.constant 0 : i32
    %c0_i32_0 = arith.constant 0 : i32
    %c0_i32_1 = arith.constant 0 : i32
    %c0_i32_2 = arith.constant 0 : i32
    return %c0_i32, %c0_i32_0, %c0_i32_1 : i32, i32, i32
  }
  func.func @transform_3(%arg0: i32) -> (i32, i32) {
    %c0_i32 = arith.constant 0 : i32
    %c0_i32_0 = arith.constant 0 : i32
    %c0_i32_1 = arith.constant 0 : i32
    return %c0_i32, %c0_i32_0 : i32, i32
  }
  func.func @transform_4(%arg0: i32) -> (i32, i32) {
    %c0_i32 = arith.constant 0 : i32
    %c0_i32_0 = arith.constant 0 : i32
    return %c0_i32, %arg0 : i32, i32
  }
}

</mosaic_0001>

<bundles_post_ra>
// kernel: convsc_forward.1
= control target key start
LH: loop header
LB: loop body
LE: loop exit
PB: predicated region body
PF: predicated region fallthrough
CT: control target
= control target key end

     0   :  { %s5124_s15 = smov 0   ;;  %s5779_s0 = inlined_call_operand.vmem [shape: s32[2,256], index: 0, kind: input, shape index: {}]   ;;  %s5780_s1 = inlined_call_operand.vmem [shape: f32[4,512], index: 1, kind: input, shape index: {}]   ;;  %s5781_s2 = inlined_call_operand.vmem [shape: f32[9,8,4], index: 2, kind: input, shape index: {}]   ;;  %s5782_s3 = inlined_call_operand.vmem [shape: f32[8,3], index: 3, kind: input, shape index: {}]   ;;  %s5783_s4 = inlined_call_operand.vmem [shape: f32[8,512], index: 4, kind: output, shape index: {}]  }
   0x1 LB: > { %s4908_s16 = sadd.s32 4294967295, %s5085_s15   ;;  %p4912_p0 = scmp.ge.s32.totalorder %s5085_s15, 1  ;;  %s5085_s15 = sphi %s5124_s15, %s14_s15  }
   0x2   : > { %p163_p1 = scmp.lt.s32.totalorder %s5085_s15, 3 }
   0x4   : > { %p164_p2 = pnand %p4912_p0, %p163_p1 }
   0x5   : > { %s4913_s17 = sshll.u32 (!%p164_p2), %s4908_s16, 1  ;;  %vm272_vm0 = vcmask (!%p164_p2), 31744   ;;  %v4922_v0 = vld [vmem:[%s5781_s2 + $0x20] sm:$0xff] (!%p164_p2)  ;;  %v5087_v1 = vmov (!%p164_p2), 0.0   ;;  %v5088_v3 = vmov (!%p164_p2), 0   ;;  %vm276_vm1 = vcmask (!%p164_p2), 1043456  }
   0x6   : > { %167 = sbr.rel (%p164_p2) target bundleno = 1331 (0x533), region = 36  ;;  %p190_p3 = scmp.lt.s32.totalorder (!%p164_p2), %s4913_s17, 3  ;;  %2551 = vmatprep.mubr.f32.mxu0 (!%p164_p2), %v5087_v1  ;;  %v2242_v2 = vsel (!%p164_p2), %vm272_vm0, %v4922_v0, 0  ;;  %349 = vmatprep.mubr.f32.mxu1 (!%p164_p2), %v5087_v1  ;;  %v4918_v17 = vld [vmem:[%s5781_s2 + $0x8] sm:$0xff] (!%p164_p2)  ;;  %v210_v18 = vlaneseq (!%p164_p2)  ;;  %v5187_v20 = vld [vmem:[%s5779_s0] sm:$0xf] (!%p164_p2) }
   0x7   : > { %5065 = vset.pattern.permute.xlu0 (!%p164_p2), %v5088_v3  ;;  %v5141_v4 = vand.u32 (!%p164_p2), 4294901760, %v2242_v2  ;;  %s5089_s24 = smov (!%p164_p2), 127   ;;  %s5090_s25 = smov (!%p164_p2), 16   ;;  %v274_v19 = vsel (!%p164_p2), %vm272_vm0, %v4918_v17, 0  ;;  %v4923_v21 = vld [vmem:[%s5781_s2 + $0x28] sm:$0xff] (!%p164_p2)  ;;  %vm1229_vm2 = vcmp.lt.s32.totalorder (!%p164_p2), %v5187_v20, 15 }
   0x8   : > { %s5091_s26 = smov (!%p164_p2), 17   ;;  %s5092_s27 = smov (!%p164_p2), 113   ;;  %v5192_v22 = vshrl.u32 (!%p164_p2), %v210_v18, 7  ;;  %v5194_v23 = vand.u32 (!%p164_p2), 4294901760, %v274_v19  ;;  %vm215_vm3 = vcmp.ge.s32.totalorder (!%p164_p2), %v5187_v20, 1  ;;  %v2745_v24 = vsel (!%p164_p2), %vm272_vm0, %v4923_v21, 0 }
   0x9   : > { %v5148_v6 = vsub.f32 (!%p164_p2), %v2242_v2, %v5141_v4  ;;  %s5093_s28 = smov (!%p164_p2), 15   ;;  %s5094_s29 = smov (!%p164_p2), 112   ;;  %v5212_v29 = vsel (!%p164_p2), %vm1229_vm2, 1, %v5088_v3  ;;  %v5217_v30 = vsel (!%p164_p2), %vm215_vm3, 1, %v5088_v3  ;;  %v5222_v32 = vand.u32 (!%p164_p2), 4294901760, %v2745_v24 }
   0xa   : > { %s5095_s30 = smov (!%p164_p2), 1   ;;  %s5096_s5 = smov (!%p164_p2), 111   ;;  %v5200_v25 = vsub.s32 (!%p164_p2), 0, %v5192_v22  ;;  %v5203_v26 = vsub.s32 (!%p164_p2), 1, %v5192_v22  ;;  %v1747_v27 = vsub.s32 (!%p164_p2), 3, %v5192_v22  ;;  %v5207_v28 = vsub.s32 (!%p164_p2), 2, %v5192_v22 }
   0xb   : > { %v2317_v13 = vand.u32 (!%p164_p2), 4294901760, %v5148_v6  ;;  %v5220_v31 = vsub.f32 (!%p164_p2), %v274_v19, %v5194_v23  ;;  %v5235_v38 = vsub.f32 (!%p164_p2), %v2745_v24, %v5222_v32  ;;  %v5237_v39 = vand.u32 (!%p164_p2), 127, %v210_v18 }
   0xc   : > { %v2725_v33 = vrot.slane (!%p164_p2), %v5212_v29, %v5203_v26  ;;  %v2729_v34 = vrot.slane (!%p164_p2), %v5212_v29, %v1747_v27  ;;  %v253_v35 = vrot.slane (!%p164_p2), %v5217_v30, %v5200_v25  ;;  %v257_v36 = vrot.slane (!%p164_p2), %v5217_v30, %v5207_v28 }
   0xd   : > { %s5793_s17 = smov (!%p190_p3, %s4913_s17), 3  ;;  %v352_v37 = vand.u32 4294901760, %v5220_v31  ;;  %v2822_v47 = vand.u32 4294901760, %v5235_v38  ;;  %v4917_v48 = vrot.slane %v5217_v30, 9  ;;  %vm2719_vm4 = vcmp.lt.s32.totalorder %v5237_v39, 127 }
   0xe   : > { %s4914_s20 = sshll.u32 %s5793_s17, 2  ;;  %v2733_v40 = vrot.slane %v2725_v33, %v5203_v26  ;;  %v2737_v41 = vrot.slane %v2729_v34, %v5203_v26  ;;  %v261_v42 = vrot.slane %v253_v35, %v5200_v25  ;;  %v265_v43 = vrot.slane %v257_v36, %v5200_v25  ;;  %s4916_s6 = sshll.u32 %s5793_s17, 3 }
   0xf   : > { %s193_s23 = scalar_lea.vmem %s5780_s1, %s4914_s20  ;;  %v353_v46 = vsub.f32 %v5220_v31, %v352_v37  ;;  %vm247_vm5 = vcmp.lt.s32.totalorder %v5237_v39, 16  ;;  %v2823_v53 = vsub.f32 %v5235_v38, %v2822_v47  ;;  %vm5257_vm10 = vcmp.ne.s32.totalorder %v4917_v48, 0  ;;  %s199_s9 = scalar_lea.vmem %s5783_s4, %s4916_s6 }
  0x10   : > { %v201_v5 = vld [vmem:[%s193_s23] sm:$0xff]  ;;  %vm2738_vm6 = vcmp.eq.s32.totalorder %v2733_v40, 1  ;;  %vm5250_vm7 = vcmp.eq.s32.totalorder %v2737_v41, 1  ;;  %vm266_vm8 = vcmp.eq.s32.totalorder %v261_v42, 1  ;;  %vm267_vm9 = vcmp.eq.s32.totalorder %v265_v43, 1  ;;  %vm220_vm11 = vmand %vm215_vm3, %vm5257_vm10 }
  0x11   : > { %2715 = vrot.lane.b32.xlu1 %v201_v5, %s5089_s24  ;;  %243 = vrot.lane.b32.xlu0 %v201_v5, %s5090_s25  ;;  %v204_v7 = vcombine.high %v201_v5, %v201_v5  ;;  %v2244_v8 = vsel %vm276_vm1, %v201_v5, 0  ;;  %v354_v52 = vand.u32 4294901760, %v353_v46  ;;  %v2824_v18 = vand.u32 4294901760, %v2823_v53  ;;  %vm3227_vm12 = vmand %vm1229_vm2, %vm5257_vm10 }
  0x12   : > { %v5151_v9 = vand.u32 4294901760, %v2244_v8  ;;  %v221_v41 = vsel %vm220_vm11, 1, %v5088_v3  ;;  %v3228_v46 = vsel %vm3227_vm12, 1, %v5088_v3  ;;  %vm212_vm13 = vcmp.lt.s32.totalorder %v5237_v39, 17 }
  0x13   : > { %v2246_v10 = vsel %vm276_vm1, %v204_v7, 0  ;;  %v3236_v53 = vrot.slane %v3228_v46, %v5207_v28  ;;  %vm3224_vm14 = vcmp.lt.s32.totalorder %v5237_v39, 113 }
  0x14   : > { %v5154_v11 = vand.u32 4294901760, %v2246_v10  ;;  %v5157_v12 = vsub.f32 %v2244_v8, %v5151_v9 }
  0x15   : > { %2717 = vrot.lane.b32.xlu1 %v204_v7, %s5089_s24  ;;  %245 = vrot.lane.b32.xlu0 %v204_v7, %s5090_s25 }
  0x16   : > { %2486 = vmatprep.subr.mxu0 %v5154_v11  ;;  %v5162_v14 = vsub.f32 %v2246_v10, %v5154_v11  ;;  %v2334_v15 = vand.u32 4294901760, %v5157_v12 }
  0x17   : > { %2488 = vmatpush1.msra.mxu0 %v5151_v9 }
  0x18   : > { %2555 = vmatmul.mubr.f32.vlgmr.msra.gmra.mrb[0].mxu0 %v2317_v13  ;;  %v2328_v16 = vand.u32 4294901760, %v5162_v14 }
  0x19   : > { %208 = vrot.lane.b32.xlu1 %v204_v7, %s5091_s26  ;;  %206 = vrot.lane.b32.xlu0 %v201_v5, %s5091_s26 }
  0x1a   : > { %2564 = vmatprep.subr.mxu0 %v2328_v16  ;;  %2631 = vmatprep.mubr.f32.mxu0 %v5087_v1 }
  0x1b   : > { %2568 = vmatpush1.msra.mxu0 %v2334_v15 }
  0x1c   : > { %2640 = vmatprep.subr.mxu0 %v5154_v11 }
  0x1d   : > { %3222 = vrot.lane.b32.xlu1 %v204_v7, %s5092_s27  ;;  %3220 = vrot.lane.b32.xlu0 %v201_v5, %s5092_s27 }
  0x20   : > { %2633 = vmatmul.mubr.f32.vlgmr.msra.gmra.mrb[0].mxu0 %v5141_v4 }
  0x21   : > { %1224 = vrot.lane.b32.xlu1 %v204_v7, %s5093_s28  ;;  %1222 = vrot.lane.b32.xlu0 %v201_v5, %s5093_s28 }
  0x22   : > { %2642 = vmatpush1.msra.mxu0 %v5151_v9  ;;  %2705 = vmatprep.mubr.f32.mxu0 %v5087_v1 }
  0x25   : > { %3729 = vrot.lane.b32.xlu1 %v204_v7, %s5094_s29  ;;  %3727 = vrot.lane.b32.xlu0 %v201_v5, %s5094_s29 }
  0x28   : > { %2707 = vmatmul.mubr.f32.vlgmr.msra.gmra.mrb[0].mxu0 %v5141_v4 }
  0x29   : > { %2819 = vmatprep.mubr.f32.mxu0 %v5087_v1  ;;  %1736 = vrot.lane.b32.xlu1 %v204_v7, %s5095_s30 }
  0x2a   : > { %1734 = vrot.lane.b32.xlu0 %v201_v5, %s5095_s30 }
  0x2d   : > { %4234 = vrot.lane.b32.xlu1 %v204_v7, %s5096_s5 }
  0x2e   : > { %4232 = vrot.lane.b32.xlu0 %v201_v5, %s5096_s5 }
  0x83   : > { %v2716_v44 = vpop.permute.xlu1 %2715  ;;  %v244_v45 = vpop.permute.xlu0 %243 }
  0x87   : > { %v2718_v50 = vpop.permute.xlu1 %2717  ;;  %v246_v51 = vpop.permute.xlu0 %245 }
  0x88   : > { %v2720_v55 = vsel %vm2719_vm4, %v2716_v44, %v2718_v50  ;;  %v2721_v56 = vsel %vm2719_vm4, %v2718_v50, %v2716_v44  ;;  %v248_v57 = vsel %vm247_vm5, %v244_v45, %v246_v51  ;;  %v249_v58 = vsel %vm247_vm5, %v246_v51, %v244_v45 }
  0x89   : > { %v2740_v59 = vsel %vm2738_vm6, %v2720_v55, 0.0  ;;  %v2741_v60 = vsel %vm5250_vm7, %v2721_v56, 0.0  ;;  %v268_v61 = vsel %vm266_vm8, %v249_v58, 0.0  ;;  %v269_v62 = vsel %vm267_vm9, %v248_v57, 0.0 }
  0x8a   : > { %v2748_v63 = vsel %vm276_vm1, %v2740_v59, 0  ;;  %v2751_v0 = vsel %vm276_vm1, %v2741_v60, 0  ;;  %v278_v2 = vsel %vm276_vm1, %v268_v61, 0  ;;  %v281_v5 = vsel %vm276_vm1, %v269_v62, 0 }
  0x8b   : > { %v5267_v7 = vand.u32 4294901760, %v2751_v0  ;;  %v5269_v8 = vand.u32 4294901760, %v2748_v63  ;;  %v5271_v10 = vand.u32 4294901760, %v281_v5  ;;  %v5273_v17 = vand.u32 4294901760, %v278_v2  ;;  %v209_v54 = vpop.permute.xlu1 %208  ;;  %v207_v55 = vpop.permute.xlu0 %206 }
  0x8c   : > { %v3244_v57 = vrot.slane %v3236_v53, %v5200_v25  ;;  %v225_v58 = vrot.slane %v221_v41, %v5200_v25  ;;  %v213_v61 = vsel %vm212_vm13, %v207_v55, %v209_v54  ;;  %v3232_v62 = vrot.slane %v3228_v46, %v5200_v25 }
  0x8d   : > { %v5276_v19 = vsub.f32 %v2751_v0, %v5267_v7  ;;  %v5279_v21 = vsub.f32 %v2748_v63, %v5269_v8  ;;  %v362_v24 = vsub.f32 %v281_v5, %v5271_v10  ;;  %v5283_v33 = vsub.f32 %v278_v2, %v5273_v17  ;;  %284 = vmatprep.subr.mxu1 %v5271_v10 }
  0x8e   : > { %2754 = vmatprep.subr.mxu0 %v5267_v7  ;;  %286 = vmatpush1.msra.mxu1 %v5273_v17  ;;  %vm3246_vm4 = vcmp.eq.s32.totalorder %v3244_v57, 1  ;;  %v233_v0 = vrot.slane %v225_v58, %v5200_v25  ;;  %v3240_v5 = vrot.slane %v3232_v62, %v5200_v25  ;;  %vm3731_vm9 = vcmp.lt.s32.totalorder %v5237_v39, 112 }
  0x8f   : > { %v2839_v34 = vand.u32 4294901760, %v5279_v21  ;;  %v369_v35 = vand.u32 4294901760, %v5283_v33  ;;  %2756 = vmatpush1.msra.mxu0 %v5269_v8  ;;  %355 = vmatmul.mubr.f32.vlgmr.msra.gmra.mrb[0].mxu1 %v354_v52  ;;  %v363_v36 = vand.u32 4294901760, %v362_v24  ;;  %v2833_v40 = vand.u32 4294901760, %v5276_v19  ;;  %v3223_v59 = vpop.permute.xlu1 %3222  ;;  %v3221_v60 = vpop.permute.xlu0 %3220 }
  0x90   : > { %2825 = vmatmul.mubr.f32.vlgmr.msra.gmra.mrb[0].mxu0 %v2824_v18  ;;  %435 = vmatprep.mubr.f32.mxu1 %v5087_v1  ;;  %v229_v52 = vrot.slane %v221_v41, %v5207_v28  ;;  %v3226_v63 = vsel %vm3224_vm14, %v3223_v59, %v3221_v60  ;;  %vm238_vm5 = vcmp.eq.s32.totalorder %v233_v0, 1  ;;  %vm3245_vm6 = vcmp.eq.s32.totalorder %v3240_v5, 1 }
  0x91   : > { %v364_v42 = vsub.f32 %v362_v24, %v363_v36  ;;  %v2834_v43 = vsub.f32 %v5276_v19, %v2833_v40  ;;  %v370_v44 = vsub.f32 %v5283_v33, %v369_v35  ;;  %v2840_v45 = vsub.f32 %v5279_v21, %v2839_v34  ;;  %2905 = vmatprep.mubr.f32.mxu0 %v5087_v1 }
  0x92   : > { %v237_v56 = vrot.slane %v229_v52, %v5200_v25  ;;  %v3248_v18 = vsel %vm3246_vm4, %v3226_v63, 0.0 }
  0x93   : > { %v365_v48 = vand.u32 4294901760, %v364_v42  ;;  %v2835_v49 = vand.u32 4294901760, %v2834_v43  ;;  %v371_v50 = vand.u32 4294901760, %v370_v44  ;;  %v2841_v51 = vand.u32 4294901760, %v2840_v45  ;;  %v4924_v44 = vld [vmem:[%s5781_s2 + $0x30] sm:$0xff] }
  0x94   : > { %vm239_vm15 = vcmp.eq.s32.totalorder %v237_v56, 1  ;;  %v3258_v41 = vsel %vm276_vm1, %v3248_v18, 0 }
  0x95   : > { %366 = vmatprep.subr.mxu1 %v365_v48  ;;  %2836 = vmatprep.subr.mxu0 %v2835_v49  ;;  %v241_v2 = vsel %vm239_vm15, %v213_v61, 0.0  ;;  %v5356_v45 = vand.u32 4294901760, %v3258_v41  ;;  %v4919_v61 = vrot.slane %v5212_v29, 9  ;;  %vm4236_vm15 = vcmp.lt.s32.totalorder %v5237_v39, 111 }
  0x96   : > { %372 = vmatpush1.msra.mxu1 %v371_v50  ;;  %2842 = vmatpush1.msra.mxu0 %v2841_v51 }
  0x97   : > { %437 = vmatmul.mubr.f32.vlgmr.msra.gmra.mrb[0].mxu1 %v5194_v23  ;;  %445 = vmatprep.subr.mxu1 %v362_v24  ;;  %v214_v24 = vsel %vm212_vm13, %v209_v54, %v207_v55  ;;  %vm5437_vm7 = vcmp.ne.s32.totalorder %v4919_v61, 0 }
  0x98   : > { %2907 = vmatmul.mubr.f32.vlgmr.msra.gmra.mrb[0].mxu0 %v5222_v32  ;;  %448 = vmatpush1.msra.mxu1 %v5283_v33  ;;  %v240_v43 = vsel %vm238_vm5, %v214_v24, 0.0  ;;  %vm1234_vm8 = vmand %vm215_vm3, %vm5437_vm7  ;;  %vm1226_vm3 = vcmp.lt.s32.totalorder %v5237_v39, 15 }
  0x99   : > { %521 = vmatprep.subr.mxu1 %v5271_v10  ;;  %2915 = vmatprep.subr.mxu0 %v5276_v19  ;;  %v755_v19 = vsel %vm276_vm1, %v241_v2, 0  ;;  %v752_v49 = vsel %vm276_vm1, %v240_v43, 0 }
  0x9a   : > { %511 = vmatprep.mubr.f32.mxu1 %v5087_v1  ;;  %2918 = vmatpush1.msra.mxu0 %v5279_v21  ;;  %v5344_v42 = vand.u32 4294901760, %v755_v19 }
  0x9b   : > { %2981 = vmatprep.mubr.f32.mxu0 %v5087_v1  ;;  %2991 = vmatprep.subr.mxu0 %v5267_v7 }
  0x9f   : > { %514 = vmatmul.mubr.f32.vlgmr.msra.gmra.mrb[0].mxu1 %v5220_v31  ;;  %v5368_v31 = vsub.f32 %v755_v19, %v5344_v42  ;;  %v1235_v19 = vsel %vm1234_vm8, 1, %v5088_v3  ;;  %vm4759_vm8 = vcmask 7168  }
  0xa0   : > { %523 = vmatpush1.msra.mxu1 %v5273_v17  ;;  %2984 = vmatmul.mubr.f32.vlgmr.msra.gmra.mrb[0].mxu0 %v5235_v38  ;;  %v1243_v24 = vrot.slane %v1235_v19, %v5207_v28 }
  0xa1   : > { %599 = vmatprep.subr.mxu1 %v363_v36  ;;  %2993 = vmatpush1.msra.mxu0 %v5269_v8  ;;  %v3225_v36 = vsel %vm3224_vm14, %v3221_v60, %v3223_v59  ;;  %vm4239_vm14 = vmand %vm1229_vm2, %vm5437_vm7  ;;  %vm1738_vm2 = vcmp.lt.s32.totalorder %v5237_v39, 1 }
  0xa2   : > { %3069 = vmatprep.subr.mxu0 %v2833_v40  ;;  %586 = vmatprep.mubr.f32.mxu1 %v5087_v1  ;;  %v242_v40 = vld [vmem:[%s5781_s2] sm:$0xff]  ;;  %v3247_v46 = vsel %vm3245_vm6, %v3225_v36, 0.0  ;;  %v1225_v36 = vpop.permute.xlu1 %1224  ;;  %v1251_v43 = vrot.slane %v1243_v24, %v5200_v25 }
  0xa3   : > { %3056 = vmatprep.mubr.f32.mxu0 %v5087_v1  ;;  %v749_v48 = vsel %vm272_vm0, %v242_v40, 0  ;;  %v3255_v38 = vsel %vm276_vm1, %v3247_v46, 0  ;;  %v1223_v40 = vpop.permute.xlu0 %1222  ;;  %v1239_v46 = vrot.slane %v1235_v19, %v5200_v25 }
  0xa4   : > { %v5378_v21 = vand.u32 4294901760, %v749_v48  ;;  %vm1253_vm10 = vcmp.eq.s32.totalorder %v1251_v43, 1  ;;  %v1228_v61 = vsel %vm1226_vm3, %v1225_v36, %v1223_v40 }
  0xa7   : > { %590 = vmatmul.mubr.f32.vlgmr.msra.gmra.mrb[0].mxu1 %v352_v37  ;;  %v3252_v37 = vsel %vm272_vm0, %v4924_v44, 0 }
  0xa8   : > { %603 = vmatpush1.msra.mxu1 %v369_v35  ;;  %3060 = vmatmul.mubr.f32.vlgmr.msra.gmra.mrb[0].mxu0 %v2822_v47  ;;  %v5376_v47 = vsub.f32 %v3258_v41, %v5356_v45  ;;  %v5382_v33 = vand.u32 4294901760, %v3252_v37  ;;  %v5385_v35 = vand.u32 4294901760, %v3255_v38  ;;  %v3741_v41 = vrot.slane %v5212_v29, %v5207_v28 }
  0xa9   : > { %3073 = vmatpush1.msra.mxu0 %v2839_v34  ;;  %675 = vmatprep.subr.mxu1 %v5271_v10  ;;  %v5380_v10 = vand.u32 4294901760, %v752_v49  ;;  %v837_v34 = vand.u32 4294901760, %v5368_v31 }
  0xaa   : > { %3145 = vmatprep.subr.mxu0 %v5267_v7  ;;  %666 = vmatprep.mubr.f32.mxu1 %v5087_v1  ;;  %v5389_v7 = vsub.f32 %v749_v48, %v5378_v21  ;;  %v3340_v50 = vand.u32 4294901760, %v5376_v47  ;;  %v5398_v52 = vsub.f32 %v3252_v37, %v5382_v33  ;;  %v3749_v44 = vrot.slane %v3741_v41, %v5200_v25  ;;  %v3730_v48 = vpop.permute.xlu1 %3729  ;;  %v5547_v41 = vld [vmem:[%s5782_s3] sm:$0xff] }
  0xab   : > { %3136 = vmatprep.mubr.f32.mxu0 %v5087_v1  ;;  %v5395_v51 = vsub.f32 %v752_v49, %v5380_v10  ;;  %v838_v53 = vsub.f32 %v5368_v31, %v837_v34  ;;  %v3728_v49 = vpop.permute.xlu0 %3727  ;;  %v1227_v37 = vsel %vm1226_vm3, %v1223_v40, %v1225_v36  ;;  %4742 = vperm.xlu0 %5065, %v5547_v41  }
  0xac   : > { %v826_v54 = vand.u32 4294901760, %v5389_v7  ;;  %v3329_v56 = vand.u32 4294901760, %v5398_v52  ;;  %vm3751_vm11 = vcmp.eq.s32.totalorder %v3749_v44, 1 }
  0xad   : > { %v843_v55 = vand.u32 4294901760, %v5395_v51  ;;  %v839_v57 = vand.u32 4294901760, %v838_v53  ;;  %v3733_v53 = vsel %vm3731_vm9, %v3730_v48, %v3728_v49 }
  0xae   : > { %v827_v59 = vsub.f32 %v5389_v7, %v826_v54  ;;  %v3330_v63 = vsub.f32 %v5398_v52, %v3329_v56  ;;  %v1737_v20 = vpop.permute.xlu1 %1736 }
  0xaf   : > { %668 = vmatmul.mubr.f32.vlgmr.msra.gmra.mrb[0].mxu1 %v5194_v23  ;;  %v844_v62 = vsub.f32 %v5395_v51, %v843_v55 }
  0xb0   : > { %677 = vmatpush1.msra.mxu1 %v5273_v17  ;;  %3138 = vmatmul.mubr.f32.vlgmr.msra.gmra.mrb[0].mxu0 %v5222_v32  ;;  %v5407_v17 = vsub.f32 %v3255_v38, %v5385_v35  ;;  %v3331_v5 = vand.u32 4294901760, %v3330_v63  ;;  %v3737_v38 = vrot.slane %v5212_v29, %v5200_v25  ;;  %v4920_v63 = vld [vmem:[%s5781_s2 + $0x10] sm:$0xff] }
  0xb1   : > { %3147 = vmatpush1.msra.mxu0 %v5269_v8  ;;  %740 = vmatprep.mubr.f32.mxu1 %v5087_v1  ;;  %v3341_v8 = vsub.f32 %v5376_v47, %v3340_v50  ;;  %v845_v2 = vand.u32 4294901760, %v844_v62  ;;  %v3732_v62 = vsel %vm3731_vm9, %v3728_v49, %v3730_v48 }
  0xb2   : > { %3210 = vmatprep.mubr.f32.mxu0 %v5087_v1  ;;  %758 = vmatprep.subr.mxu1 %v5344_v42  ;;  %v3346_v58 = vand.u32 4294901760, %v5407_v17  ;;  %v3745_v29 = vrot.slane %v3737_v38, %v5200_v25 }
  0xb3   : > { %3261 = vmatprep.subr.mxu0 %v5356_v45  ;;  %v3342_v60 = vand.u32 4294901760, %v3341_v8  ;;  %v1247_v8 = vrot.slane %v1239_v46, %v5200_v25 }
  0xb4   : > { %vm3750_vm13 = vcmp.eq.s32.totalorder %v3745_v29, 1 }
  0xb5   : > { %vm1252_vm12 = vcmp.eq.s32.totalorder %v1247_v8, 1 }
  0xb7   : > { %742 = vmatmul.mubr.f32.vlgmr.msra.gmra.mrb[0].mxu1 %v5194_v23  ;;  %v3347_v23 = vsub.f32 %v5407_v17, %v3346_v58 }
  0xb8   : > { %3212 = vmatmul.mubr.f32.vlgmr.msra.gmra.mrb[0].mxu0 %v5222_v32  ;;  %760 = vmatpush1.msra.mxu1 %v5380_v10  ;;  %v828_v32 = vand.u32 4294901760, %v827_v59  ;;  %v3753_v59 = vsel %vm3751_vm11, %v3733_v53, 0.0 }
  0xb9   : > { %823 = vmatprep.mubr.f32.mxu1 %v5087_v1  ;;  %840 = vmatprep.subr.mxu1 %v839_v57  ;;  %v3348_v18 = vand.u32 4294901760, %v3347_v23  ;;  %v1255_v57 = vsel %vm1253_vm10, %v1227_v37, 0.0  ;;  %v1254_v23 = vsel %vm1252_vm12, %v1228_v61, 0.0  ;;  %v1735_v61 = vpop.permute.xlu0 %1734 }
  0xba   : > { %3263 = vmatpush1.msra.mxu0 %v5385_v35  ;;  %3326 = vmatprep.mubr.f32.mxu0 %v5087_v1 }
  0xbb   : > { %3343 = vmatprep.subr.mxu0 %v3342_v60  ;;  %v1265_v60 = vsel %vm276_vm1, %v1255_v57, 0 }
  0xbf   : > { %829 = vmatmul.mubr.f32.vlgmr.msra.gmra.mrb[0].mxu1 %v828_v32  ;;  %v3752_v32 = vsel %vm3750_vm13, %v3732_v62, 0.0  ;;  %v4233_v62 = vpop.permute.xlu0 %4232 }
  0xc0   : > { %846 = vmatpush1.msra.mxu1 %v845_v2  ;;  %3332 = vmatmul.mubr.f32.vlgmr.msra.gmra.mrb[0].mxu0 %v3331_v5  ;;  %v1259_v2 = vsel %vm272_vm0, %v4920_v63, 0  ;;  %v1262_v5 = vsel %vm276_vm1, %v1254_v23, 0  ;;  %v1739_v23 = vsel %vm1738_vm2, %v1735_v61, %v1737_v20  ;;  %v2318_v63 = vsub.f32 %v5148_v6, %v2317_v13 }
  0xc1   : > { %919 = vmatprep.subr.mxu1 %v5368_v31  ;;  %909 = vmatprep.mubr.f32.mxu1 %v5087_v1  ;;  %v3763_v31 = vsel %vm276_vm1, %v3753_v59, 0  ;;  %v4240_v59 = vsel %vm4239_vm14, 1, %v5088_v3 }
  0xc2   : > { %3349 = vmatpush1.msra.mxu0 %v3348_v18  ;;  %3412 = vmatprep.mubr.f32.mxu0 %v5087_v1  ;;  %v4248_v0 = vrot.slane %v4240_v59, %v5207_v28  ;;  %v4235_v28 = vpop.permute.xlu1 %4234 }
  0xc3   : > { %3422 = vmatprep.subr.mxu0 %v5376_v47  ;;  %v4925_v47 = vld [vmem:[%s5781_s2 + $0x38] sm:$0xff] }
  0xc4   : > { %v4256_v3 = vrot.slane %v4248_v0, %v5200_v25 }
  0xc6   : > { %vm4258_vm5 = vcmp.eq.s32.totalorder %v4256_v3, 1 }
  0xc7   : > { %911 = vmatmul.mubr.f32.vlgmr.msra.gmra.mrb[0].mxu1 %v5378_v21 }
  0xc8   : > { %922 = vmatpush1.msra.mxu1 %v5395_v51  ;;  %3414 = vmatmul.mubr.f32.vlgmr.msra.gmra.mrb[0].mxu0 %v5382_v33  ;;  %v3760_v51 = vsel %vm276_vm1, %v3752_v32, 0  ;;  %v4238_v32 = vsel %vm4236_vm15, %v4235_v28, %v4233_v62 }
  0xc9   : > { %995 = vmatprep.subr.mxu1 %v5344_v42  ;;  %985 = vmatprep.mubr.f32.mxu1 %v5087_v1 }
  0xca   : > { %3425 = vmatpush1.msra.mxu0 %v5407_v17  ;;  %3488 = vmatprep.mubr.f32.mxu0 %v5087_v1  ;;  %v5522_v17 = vand.u32 4294901760, %v1259_v2 }
  0xcb   : > { %3498 = vmatprep.subr.mxu0 %v5356_v45 }
  0xcf   : > { %988 = vmatmul.mubr.f32.vlgmr.msra.gmra.mrb[0].mxu1 %v5389_v7 }
  0xd0   : > { %997 = vmatpush1.msra.mxu1 %v5380_v10  ;;  %3491 = vmatmul.mubr.f32.vlgmr.msra.gmra.mrb[0].mxu0 %v5398_v52 }
  0xd1   : > { %1073 = vmatprep.subr.mxu1 %v837_v34  ;;  %3500 = vmatpush1.msra.mxu0 %v5385_v35  ;;  %v5488_v34 = vand.u32 4294901760, %v1265_v60 }
  0xd2   : > { %1060 = vmatprep.mubr.f32.mxu1 %v5087_v1  ;;  %3563 = vmatprep.mubr.f32.mxu0 %v5087_v1 }
  0xd3   : > { %3576 = vmatprep.subr.mxu0 %v3340_v50  ;;  %v5500_v50 = vand.u32 4294901760, %v3763_v31  ;;  %v5512_v7 = vsub.f32 %v1265_v60, %v5488_v34  ;;  %v1748_v60 = vrot.slane %v5217_v30, %v1747_v27  ;;  %v1744_v27 = vrot.slane %v5217_v30, %v5203_v26 }
  0xd5   : > { %v5520_v52 = vsub.f32 %v3763_v31, %v5500_v50  ;;  %v1756_v31 = vrot.slane %v1748_v60, %v5203_v26  ;;  %v1752_v30 = vrot.slane %v1744_v27, %v5203_v26 }
  0xd7   : > { %1064 = vmatmul.mubr.f32.vlgmr.msra.gmra.mrb[0].mxu1 %v826_v54  ;;  %v3757_v54 = vsel %vm272_vm0, %v4925_v47, 0  ;;  %v3845_v18 = vand.u32 4294901760, %v5520_v52  ;;  %vm5613_vm4 = vcmp.eq.s32.totalorder %v1756_v31, 1  ;;  %v4244_v47 = vrot.slane %v4240_v59, %v5200_v25 }
  0xd8   : > { %1077 = vmatpush1.msra.mxu1 %v843_v55  ;;  %3567 = vmatmul.mubr.f32.vlgmr.msra.gmra.mrb[0].mxu0 %v3329_v56  ;;  %v5526_v55 = vand.u32 4294901760, %v3757_v54  ;;  %v1347_v56 = vand.u32 4294901760, %v5512_v7  ;;  %vm1757_vm6 = vcmp.eq.s32.totalorder %v1752_v30, 1 }
  0xd9   : > { %3580 = vmatpush1.msra.mxu0 %v3346_v58  ;;  %1149 = vmatprep.subr.mxu1 %v5344_v42  ;;  %v5524_v42 = vand.u32 4294901760, %v1262_v5  ;;  %v5529_v58 = vand.u32 4294901760, %v3760_v51 }
  0xda   : > { %3652 = vmatprep.subr.mxu0 %v5356_v45  ;;  %1140 = vmatprep.mubr.f32.mxu1 %v5087_v1  ;;  %v5533_v45 = vsub.f32 %v1259_v2, %v5522_v17  ;;  %v5542_v24 = vsub.f32 %v3757_v54, %v5526_v55  ;;  %v1760_v2 = vsel %vm5613_vm4, %v1739_v23, 0.0  ;;  %v4260_v54 = vsel %vm4258_vm5, %v4238_v32, 0.0 }
  0xdb   : > { %3643 = vmatprep.mubr.f32.mxu0 %v5087_v1  ;;  %v5539_v19 = vsub.f32 %v1262_v5, %v5524_v42  ;;  %v5556_v36 = vsub.f32 %v3760_v51, %v5529_v58  ;;  %v4252_v5 = vrot.slane %v4244_v47, %v5200_v25  ;;  %v1770_v26 = vsel %vm276_vm1, %v1760_v2, 0 }
  0xdc   : > { %v1336_v40 = vand.u32 4294901760, %v5533_v45  ;;  %v3834_v44 = vand.u32 4294901760, %v5542_v24  ;;  %v1740_v51 = vsel %vm1738_vm2, %v1737_v20, %v1735_v61  ;;  %v4237_v25 = vsel %vm4236_vm15, %v4233_v62, %v4235_v28 }
  0xdd   : > { %v1353_v43 = vand.u32 4294901760, %v5539_v19  ;;  %v3851_v48 = vand.u32 4294901760, %v5556_v36  ;;  %vm4257_vm7 = vcmp.eq.s32.totalorder %v4252_v5, 1  ;;  %v2335_v23 = vsub.f32 %v5157_v12, %v2334_v15 }
  0xde   : > { %v1337_v49 = vsub.f32 %v5533_v45, %v1336_v40  ;;  %v3835_v53 = vsub.f32 %v5542_v24, %v3834_v44  ;;  %v4259_v39 = vsel %vm4257_vm7, %v4237_v25, 0.0 }
  0xdf   : > { %1142 = vmatmul.mubr.f32.vlgmr.msra.gmra.mrb[0].mxu1 %v5378_v21  ;;  %v1354_v38 = vsub.f32 %v5539_v19, %v1353_v43 }
  0xe0   : > { %1151 = vmatpush1.msra.mxu1 %v5380_v10  ;;  %3645 = vmatmul.mubr.f32.vlgmr.msra.gmra.mrb[0].mxu0 %v5382_v33  ;;  %v1348_v10 = vsub.f32 %v5512_v7, %v1347_v56  ;;  %v3836_v57 = vand.u32 4294901760, %v3835_v53 }
  0xe1   : > { %3654 = vmatpush1.msra.mxu0 %v5385_v35  ;;  %1214 = vmatprep.mubr.f32.mxu1 %v5087_v1  ;;  %v3846_v35 = vsub.f32 %v5520_v52, %v3845_v18  ;;  %v1355_v8 = vand.u32 4294901760, %v1354_v38 }
  0xe2   : > { %3717 = vmatprep.mubr.f32.mxu0 %v5087_v1  ;;  %1268 = vmatprep.subr.mxu1 %v5488_v34  ;;  %v1349_v46 = vand.u32 4294901760, %v1348_v10  ;;  %v4921_v10 = vld [vmem:[%s5781_s2 + $0x18] sm:$0xff] }
  0xe3   : > { %3766 = vmatprep.subr.mxu0 %v5500_v50  ;;  %v3847_v37 = vand.u32 4294901760, %v3846_v35  ;;  %v1759_v35 = vsel %vm1757_vm6, %v1740_v51, 0.0 }
  0xe7   : > { %1216 = vmatmul.mubr.f32.vlgmr.msra.gmra.mrb[0].mxu1 %v5378_v21  ;;  %v3852_v21 = vsub.f32 %v5556_v36, %v3851_v48 }
  0xe8   : > { %3719 = vmatmul.mubr.f32.vlgmr.msra.gmra.mrb[0].mxu0 %v5382_v33  ;;  %1270 = vmatpush1.msra.mxu1 %v5524_v42  ;;  %v1338_v33 = vand.u32 4294901760, %v1337_v49  ;;  %v1767_v49 = vsel %vm276_vm1, %v1759_v35, 0 }
  0xe9   : > { %1333 = vmatprep.mubr.f32.mxu1 %v5087_v1  ;;  %1350 = vmatprep.subr.mxu1 %v1349_v46  ;;  %v3853_v29 = vand.u32 4294901760, %v3852_v21  ;;  %v1764_v46 = vsel %vm272_vm0, %v4921_v10, 0 }
  0xea   : > { %3768 = vmatpush1.msra.mxu0 %v5529_v58  ;;  %3831 = vmatprep.mubr.f32.mxu0 %v5087_v1 }
  0xeb   : > { %3848 = vmatprep.subr.mxu0 %v3847_v37 }
  0xef   : > { %1339 = vmatmul.mubr.f32.vlgmr.msra.gmra.mrb[0].mxu1 %v1338_v33 }
  0xf0   : > { %1356 = vmatpush1.msra.mxu1 %v1355_v8  ;;  %3837 = vmatmul.mubr.f32.vlgmr.msra.gmra.mrb[0].mxu0 %v3836_v57 }
  0xf1   : > { %1429 = vmatprep.subr.mxu1 %v5512_v7  ;;  %1419 = vmatprep.mubr.f32.mxu1 %v5087_v1  ;;  %v4270_v7 = vsel %vm276_vm1, %v4260_v54, 0 }
  0xf2   : > { %3854 = vmatpush1.msra.mxu0 %v3853_v29  ;;  %3917 = vmatprep.mubr.f32.mxu0 %v5087_v1 }
  0xf3   : > { %3927 = vmatprep.subr.mxu0 %v5520_v52  ;;  %v4926_v52 = vld [vmem:[%s5781_s2 + $0x40] sm:$0xff] }
  0xf7   : > { %1421 = vmatmul.mubr.f32.vlgmr.msra.gmra.mrb[0].mxu1 %v5522_v17 }
  0xf8   : > { %1432 = vmatpush1.msra.mxu1 %v5539_v19  ;;  %3919 = vmatmul.mubr.f32.vlgmr.msra.gmra.mrb[0].mxu0 %v5526_v55  ;;  %v4267_v19 = vsel %vm276_vm1, %v4259_v39, 0  ;;  %vm4750_vm1 = vcmp.lt.s32.totalorder %v5192_v22, 4 }
  0xf9   : > { %1505 = vmatprep.subr.mxu1 %v5488_v34  ;;  %1495 = vmatprep.mubr.f32.mxu1 %v5087_v1 }
  0xfa   : > { %3930 = vmatpush1.msra.mxu0 %v5556_v36  ;;  %3993 = vmatprep.mubr.f32.mxu0 %v5087_v1  ;;  %v5674_v36 = vand.u32 4294901760, %v1764_v46 }
  0xfb   : > { %4003 = vmatprep.subr.mxu0 %v5500_v50 }
  0xff   : > { %1498 = vmatmul.mubr.f32.vlgmr.msra.gmra.mrb[0].mxu1 %v5533_v45 }
 0x100   : > { %1507 = vmatpush1.msra.mxu1 %v5524_v42  ;;  %3996 = vmatmul.mubr.f32.vlgmr.msra.gmra.mrb[0].mxu0 %v5542_v24 }
 0x101   : > { %1583 = vmatprep.subr.mxu1 %v1347_v56  ;;  %4005 = vmatpush1.msra.mxu0 %v5529_v58  ;;  %v5640_v56 = vand.u32 4294901760, %v1770_v26 }
 0x102   : > { %1570 = vmatprep.mubr.f32.mxu1 %v5087_v1  ;;  %4068 = vmatprep.mubr.f32.mxu0 %v5087_v1 }
 0x103   : > { %4081 = vmatprep.subr.mxu0 %v3845_v18  ;;  %v5652_v18 = vand.u32 4294901760, %v4270_v7  ;;  %v5664_v45 = vsub.f32 %v1770_v26, %v5640_v56 }
 0x105   : > { %v5672_v24 = vsub.f32 %v4270_v7, %v5652_v18 }
 0x107   : > { %1574 = vmatmul.mubr.f32.vlgmr.msra.gmra.mrb[0].mxu1 %v1336_v40  ;;  %v4264_v40 = vsel %vm272_vm0, %v4926_v52, 0  ;;  %v4352_v37 = vand.u32 4294901760, %v5672_v24  ;;  %vm4752_vm0 = vcmp.ge.s32.totalorder %v5192_v22, 4 }
 0x108   : > { %1587 = vmatpush1.msra.mxu1 %v1353_v43  ;;  %4072 = vmatmul.mubr.f32.vlgmr.msra.gmra.mrb[0].mxu0 %v3834_v44  ;;  %v5678_v43 = vand.u32 4294901760, %v4264_v40  ;;  %v1852_v44 = vand.u32 4294901760, %v5664_v45 }
 0x109   : > { %4085 = vmatpush1.msra.mxu0 %v3851_v48  ;;  %1659 = vmatprep.subr.mxu1 %v5488_v34  ;;  %v5676_v34 = vand.u32 4294901760, %v1767_v49  ;;  %v5681_v48 = vand.u32 4294901760, %v4267_v19  ;;  %v4353_v8 = vsub.f32 %v5672_v24, %v4352_v37 }
 0x10a   : > { %4157 = vmatprep.subr.mxu0 %v5500_v50  ;;  %1650 = vmatprep.mubr.f32.mxu1 %v5087_v1  ;;  %v1840_v50 = vsub.f32 %v1764_v46, %v5674_v36  ;;  %v4340_v53 = vsub.f32 %v4264_v40, %v5678_v43  ;;  %v1853_v21 = vsub.f32 %v5664_v45, %v1852_v44 }
 0x10b   : > { %4148 = vmatprep.mubr.f32.mxu0 %v5087_v1  ;;  %v1857_v38 = vsub.f32 %v1767_v49, %v5676_v34  ;;  %v4357_v33 = vsub.f32 %v4267_v19, %v5681_v48  ;;  %v4354_v0 = vand.u32 4294901760, %v4353_v8 }
 0x10c   : > { %v4341_v29 = vand.u32 4294901760, %v4340_v53  ;;  %v1854_v59 = vand.u32 4294901760, %v1853_v21  ;;  %v5097_v21 = vmov 1  }
 0x10d   : > { %v1858_v57 = vand.u32 4294901760, %v1857_v38  ;;  %v4358_v60 = vand.u32 4294901760, %v4357_v33  ;;  %5066 = vset.pattern.permute.xlu1 %v5097_v21 }
 0x10e   : > { %v4342_v61 = vsub.f32 %v4340_v53, %v4341_v29 }
 0x10f   : > { %1652 = vmatmul.mubr.f32.vlgmr.msra.gmra.mrb[0].mxu1 %v5522_v17  ;;  %v1859_v20 = vsub.f32 %v1857_v38, %v1858_v57  ;;  %v4359_v31 = vsub.f32 %v4357_v33, %v4358_v60 }
 0x110   : > { %1661 = vmatpush1.msra.mxu1 %v5524_v42  ;;  %4150 = vmatmul.mubr.f32.vlgmr.msra.gmra.mrb[0].mxu0 %v5526_v55  ;;  %v1841_v42 = vand.u32 4294901760, %v1840_v50 }
 0x111   : > { %4159 = vmatpush1.msra.mxu0 %v5529_v58  ;;  %1724 = vmatprep.mubr.f32.mxu1 %v5087_v1  ;;  %v1860_v27 = vand.u32 4294901760, %v1859_v20  ;;  %v4360_v28 = vand.u32 4294901760, %v4359_v31 }
 0x112   : > { %4222 = vmatprep.mubr.f32.mxu0 %v5087_v1  ;;  %1773 = vmatprep.subr.mxu1 %v5640_v56  ;;  %v1842_v58 = vsub.f32 %v1840_v50, %v1841_v42 }
 0x113   : > { %4273 = vmatprep.subr.mxu0 %v5652_v18 }
 0x114   : > { %v1843_v3 = vand.u32 4294901760, %v1842_v58 }
 0x117   : > { %1726 = vmatmul.mubr.f32.vlgmr.msra.gmra.mrb[0].mxu1 %v5522_v17  ;;  %v4343_v17 = vand.u32 4294901760, %v4342_v61 }
 0x118   : > { %4224 = vmatmul.mubr.f32.vlgmr.msra.gmra.mrb[0].mxu0 %v5526_v55  ;;  %1775 = vmatpush1.msra.mxu1 %v5676_v34  ;;  %v2329_v55 = vsub.f32 %v5162_v14, %v2328_v16  ;;  %v2319_v16 = vand.u32 4294901760, %v2318_v63 }
 0x119   : > { %1838 = vmatprep.mubr.f32.mxu1 %v5087_v1  ;;  %1855 = vmatprep.subr.mxu1 %v1854_v59 }
 0x11a   : > { %4275 = vmatpush1.msra.mxu0 %v5681_v48  ;;  %4338 = vmatprep.mubr.f32.mxu0 %v5087_v1  ;;  %v2330_v62 = vand.u32 4294901760, %v2329_v55 }
 0x11b   : > { %4355 = vmatprep.subr.mxu0 %v4354_v0 }
 0x11f   : > { %1844 = vmatmul.mubr.f32.vlgmr.msra.gmra.mrb[0].mxu1 %v1843_v3 }
 0x120   : > { %1861 = vmatpush1.msra.mxu1 %v1860_v27  ;;  %4344 = vmatmul.mubr.f32.vlgmr.msra.gmra.mrb[0].mxu0 %v4343_v17 }
 0x121   : > { %1934 = vmatprep.subr.mxu1 %v5664_v45  ;;  %1924 = vmatprep.mubr.f32.mxu1 %v5087_v1 }
 0x122   : > { %4361 = vmatpush1.msra.mxu0 %v4360_v28  ;;  %4424 = vmatprep.mubr.f32.mxu0 %v5087_v1 }
 0x123   : > { %4434 = vmatprep.subr.mxu0 %v5672_v24 }
 0x127   : > { %1926 = vmatmul.mubr.f32.vlgmr.msra.gmra.mrb[0].mxu1 %v5674_v36 }
 0x128   : > { %1937 = vmatpush1.msra.mxu1 %v1857_v38  ;;  %4426 = vmatmul.mubr.f32.vlgmr.msra.gmra.mrb[0].mxu0 %v5678_v43 }
 0x129   : > { %2010 = vmatprep.subr.mxu1 %v5640_v56  ;;  %2000 = vmatprep.mubr.f32.mxu1 %v5087_v1 }
 0x12a   : > { %4437 = vmatpush1.msra.mxu0 %v4357_v33  ;;  %4500 = vmatprep.mubr.f32.mxu0 %v5087_v1  ;;  %v4743_v47 = vpop.permute.xlu0 %4742  ;;  %v5098_v33 = vmov 2  }
 0x12b   : > { %4510 = vmatprep.subr.mxu0 %v5652_v18  ;;  %5067 = vset.pattern.permute.xlu0 %v5098_v33 }
 0x12f   : > { %2003 = vmatmul.mubr.f32.vlgmr.msra.gmra.mrb[0].mxu1 %v1840_v50 }
 0x130   : > { %2012 = vmatpush1.msra.mxu1 %v5676_v34  ;;  %4503 = vmatmul.mubr.f32.vlgmr.msra.gmra.mrb[0].mxu0 %v4340_v53 }
 0x131   : > { %2088 = vmatprep.subr.mxu1 %v1852_v44  ;;  %4512 = vmatpush1.msra.mxu0 %v5681_v48 }
 0x132   : > { %2075 = vmatprep.mubr.f32.mxu1 %v5087_v1  ;;  %4575 = vmatprep.mubr.f32.mxu0 %v5087_v1 }
 0x133   : > { %4588 = vmatprep.subr.mxu0 %v4352_v37 }
 0x137   : > { %2079 = vmatmul.mubr.f32.vlgmr.msra.gmra.mrb[0].mxu1 %v1841_v42 }
 0x138   : > { %2092 = vmatpush1.msra.mxu1 %v1858_v57  ;;  %4579 = vmatmul.mubr.f32.vlgmr.msra.gmra.mrb[0].mxu0 %v4341_v29 }
 0x139   : > { %4592 = vmatpush1.msra.mxu0 %v4358_v60  ;;  %2164 = vmatprep.subr.mxu1 %v5640_v56 }
 0x13a   : > { %4664 = vmatprep.subr.mxu0 %v5652_v18  ;;  %2155 = vmatprep.mubr.f32.mxu1 %v5087_v1 }
 0x13b   : > { %4655 = vmatprep.mubr.f32.mxu0 %v5087_v1 }
 0x13f   : > { %2157 = vmatmul.mubr.f32.vlgmr.msra.gmra.mrb[0].mxu1 %v5674_v36 }
 0x140   : > { %2166 = vmatpush1.msra.mxu1 %v5676_v34  ;;  %4657 = vmatmul.mubr.f32.vlgmr.msra.gmra.mrb[0].mxu0 %v5678_v43 }
 0x141   : > { %4666 = vmatpush1.msra.mxu0 %v5681_v48  ;;  %2229 = vmatprep.mubr.f32.mxu1 %v5087_v1 }
 0x142   : > { %4729 = vmatprep.mubr.f32.mxu0 %v5087_v1  ;;  %2249 = vmatprep.subr.mxu1 %v5154_v11  ;;  %v2336_v11 = vand.u32 4294901760, %v2335_v23 }
 0x147   : > { %2231 = vmatmul.mubr.f32.vlgmr.msra.gmra.mrb[0].mxu1 %v5674_v36 }
 0x148   : > { %4731 = vmatmul.mubr.f32.vlgmr.msra.gmra.mrb[0].mxu0 %v5678_v43  ;;  %2251 = vmatpush1.msra.mxu1 %v5151_v9 }
 0x149   : > { %2314 = vmatprep.mubr.f32.mxu1 %v5087_v1  ;;  %2331 = vmatprep.subr.mxu1 %v2330_v62 }
 0x14f   : > { %2320 = vmatmul.mubr.f32.vlgmr.msra.gmra.mrb[0].mxu1 %v2319_v16 }
 0x150   : > { %2337 = vmatpush1.msra.mxu1 %v2336_v11  ;;  %2400 = vmatprep.mubr.f32.mxu1 %v5087_v1 }
 0x151   : > { %2410 = vmatprep.subr.mxu1 %v5162_v14 }
 0x157   : > { %2402 = vmatmul.mubr.f32.vlgmr.msra.gmra.mrb[0].mxu1 %v5141_v4 }
 0x158   : > { %2413 = vmatpush1.msra.mxu1 %v5157_v12  ;;  %2476 = vmatprep.mubr.f32.mxu1 %v5087_v1 }
 0x15f   : > { %2479 = vmatmul.mubr.f32.vlgmr.msra.gmra.mrb[0].mxu1 %v5148_v6 }
 0x21b   : > { %v4732_v9 = vpop.f32.mrb[0].mxu0 }
 0x21c   : > { %v4734_v13 = vpop.f32.mrb[1].mxu0 }
 0x232   : > { %v2480_v15 = vpop.f32.mrb[0].mxu1 }
 0x233   : > { %v4931_v32 = vadd.f32 %v4732_v9, %v2480_v15  ;;  %v2482_v30 = vpop.f32.mrb[1].mxu1 }
 0x234   : > { %v4932_v2 = vadd.f32 %v4734_v13, %v2482_v30 }
 0x235   : > { %v4745_v5 = vadd.f32 %v4931_v32, %v4743_v47 }
 0x236   : > { %v4746_v54 = vadd.f32 %v4932_v2, %v4743_v47 }
 0x238   : > { %v4755_v26 = vadd.f32 %v4746_v54, %v4745_v5 }
 0x23a   : > { %4756 = vadd.xlane.f32.xlu1 %v4755_v26 }
 0x2c7   : > { %v4757_v4 = vpop.xlane.xlu1 %4756 }
 0x2c8   : > { %v4772_v1 = vsel %vm4752_vm0, %v4757_v4, 0.0  ;;  %v4758_v6 = vsel %vm4750_vm1, %v4757_v4, 0.0 }
 0x2c9   : > { %v4773_v12 = vsel %vm4759_vm8, %v4772_v1, 0.0  ;;  %v4760_v14 = vsel %vm4759_vm8, %v4758_v6, 0.0 }
 0x2ca   : > { %4774 = vadd.xlane.f32.xlu1 %v4773_v12  ;;  %4761 = vadd.xlane.f32.xlu0 %v4760_v14 }
 0x357   : > { %v4775_v51 = vpop.xlane.xlu1 %4774  ;;  %v4762_v7 = vpop.xlane.xlu0 %4761 }
 0x358   : > { %v4776_v56 = vrot.slane %v4775_v51, 4  ;;  %v4763_v25 = vrot.slane %v4762_v7, 4 }
 0x35a   : > { %v4777_v10 = vadd.f32 %v4776_v56, %v4775_v51  ;;  %v4764_v35 = vadd.f32 %v4763_v25, %v4762_v7 }
 0x35c   : > { %v4778_v52 = vrot.slane %v4777_v10, 2  ;;  %v4765_v18 = vrot.slane %v4764_v35, 2 }
 0x35e   : > { %v4766_v39 = vadd.f32 %v4765_v18, %v4764_v35  ;;  %v4779_v46 = vadd.f32 %v4778_v52, %v4777_v10 }
 0x360   : > { %v4767_v49 = vrot.slane %v4766_v39, 1  ;;  %v4780_v45 = vrot.slane %v4779_v46, 1 }
 0x362   : > { %v4768_v40 = vadd.f32 %v4767_v49, %v4766_v39  ;;  %v4781_v19 = vadd.f32 %v4780_v45, %v4779_v46 }
 0x364   : > { %5037 = vpush %v4768_v40 }
 0x365   : > { %5039 = vpush %v4781_v19 }
 0x395   : > { %s5038_s28 = spop %5037 }
 0x396   : > { %v4770_v24 = vstv %s5038_s28  ;;  %s5040_s29 = spop %5039 }
 0x397   : > { %v4771_v36 = vsel %vm4750_vm1, %v4770_v24, 0.0  ;;  %v4783_v34 = vstv %s5040_s29 }
 0x398   : > { %v4784_v43 = vsel %vm4752_vm0, %v4783_v34, %v4771_v36 }
 0x399   : > { %v4785_v44 = vmul.f32 0.0009765625, %v4784_v43 }
 0x39b   : > { %v4786_v48 = vsub.f32 %v4745_v5, %v4785_v44  ;;  %v4787_v50 = vsub.f32 %v4746_v54, %v4785_v44 }
 0x39d   : > { %v4788_v37 = vmul.f32 %v4786_v48, %v4786_v48  ;;  %v4789_v38 = vmul.f32 %v4787_v50, %v4787_v50 }
 0x39f   : > { %v4790_v53 = vadd.f32 %v4789_v38, %v4788_v37 }
 0x3a1   : > { %4791 = vadd.xlane.f32.xlu0 %v4790_v53 }
 0x42e   : > { %v4792_v42 = vpop.xlane.xlu0 %4791 }
 0x42f   : > { %v4806_v8 = vsel %vm4752_vm0, %v4792_v42, 0.0  ;;  %v4793_v57 = vsel %vm4750_vm1, %v4792_v42, 0.0 }
 0x430   : > { %v4807_v29 = vsel %vm4759_vm8, %v4806_v8, 0.0  ;;  %v4794_v59 = vsel %vm4759_vm8, %v4793_v57, 0.0 }
 0x431   : > { %4808 = vadd.xlane.f32.xlu0 %v4807_v29  ;;  %4795 = vadd.xlane.f32.xlu1 %v4794_v59 }
 0x442   : > { %4825 = vperm.xlu1 %5066, %v5547_v41  }
 0x447   : > { %4831 = vperm.xlu0 %5067, %v5547_v41  }
 0x4be   : > { %v4809_v60 = vpop.xlane.xlu0 %4808  ;;  %v4796_v58 = vpop.xlane.xlu1 %4795 }
 0x4bf   : > { %v4810_v0 = vrot.slane %v4809_v60, 4  ;;  %v4797_v20 = vrot.slane %v4796_v58, 4 }
 0x4c1   : > { %v4811_v61 = vadd.f32 %v4810_v0, %v4809_v60  ;;  %v4798_v31 = vadd.f32 %v4797_v20, %v4796_v58 }
 0x4c2   : > { %v4826_v32 = vpop.permute.xlu1 %4825 }
 0x4c3   : > { %v4812_v3 = vrot.slane %v4811_v61, 2  ;;  %v4799_v27 = vrot.slane %v4798_v31, 2 }
 0x4c5   : > { %v4800_v17 = vadd.f32 %v4799_v27, %v4798_v31  ;;  %v4813_v28 = vadd.f32 %v4812_v3, %v4811_v61 }
 0x4c6   : > { %v4832_v5 = vpop.permute.xlu0 %4831 }
 0x4c7   : > { %v4801_v55 = vrot.slane %v4800_v17, 1  ;;  %v4814_v62 = vrot.slane %v4813_v28, 1 }
 0x4c9   : > { %v4802_v63 = vadd.f32 %v4801_v55, %v4800_v17  ;;  %v4815_v23 = vadd.f32 %v4814_v62, %v4813_v28 }
 0x4cb   : > { %5041 = vpush %v4802_v63 }
 0x4cc   : > { %5043 = vpush %v4815_v23 }
 0x4fc   : > { %s5042_s30 = spop %5041 }
 0x4fd   : > { %v4804_v16 = vstv %s5042_s30  ;;  %s5044_s5 = spop %5043 }
 0x4fe   : > { %v4805_v41 = vsel %vm4750_vm1, %v4804_v16, 0.0  ;;  %v4817_v11 = vstv %s5044_s5 }
 0x4ff   : > { %v4818_v9 = vsel %vm4752_vm0, %v4817_v11, %v4805_v41 }
 0x500   : > { %v4819_v13 = vmul.f32 0.0009765625, %v4818_v9 }
 0x502   : > { %v4820_v15 = vadd.f32 1e-05, %v4819_v13 }
 0x504   : > { %5069 = vrsqrt.f32 %v4820_v15 }
 0x50e   : > { %v5070_v47 = vpop.eup %5069 }
 0x50f   : > { %v4822_v30 = vmul.f32 %v5070_v47, %v4786_v48  ;;  %v4823_v2 = vmul.f32 %v5070_v47, %v4787_v50 }
 0x511   : > { %v4828_v54 = vmul.f32 %v4826_v32, %v4822_v30  ;;  %v4829_v26 = vmul.f32 %v4826_v32, %v4823_v2 }
 0x513   : > { %v4834_v4 = vadd.f32 %v4832_v5, %v4828_v54  ;;  %v4835_v1 = vadd.f32 %v4832_v5, %v4829_v26 }
 0x515   : > { %v4927_v6 = vmul.f32 -1.442695, %v4834_v4  ;;  %v4928_v12 = vmul.f32 -1.442695, %v4835_v1 }
 0x517   : > { %5071 = vpow2.f32 %v4927_v6 }
 0x518   : > { %5073 = vpow2.f32 %v4928_v12 }
 0x521   : > { %v5072_v14 = vpop.eup %5071 }
 0x522   : > { %v5074_v22 = vpop.eup %5073  ;;  %v4842_v51 = vadd.f32 1.0, %v5072_v14 }
 0x523   : > { %v4843_v7 = vadd.f32 1.0, %v5074_v22 }
 0x524   : > { %5075 = vrcp.f32 %v4842_v51 }
 0x525   : > { %5077 = vrcp.f32 %v4843_v7 }
 0x52e   : > { %v5076_v56 = vpop.eup %5075 }
 0x52f   : > { %v5078_v25 = vpop.eup %5077  ;;  %v4848_v10 = vmul.f32 %v5076_v56, %v4834_v4 }
 0x530   : > { %v4849_v35 = vmul.f32 %v5078_v25, %v4835_v1 }
 0x531   : > { %4850 = vst [vmem:[%s199_s9] sm:$0xff] %v4848_v10 }
 0x532   : > { %4851 = vst [vmem:[%s199_s9 + $0x8] sm:$0xff] %v4849_v35 }
 0x533 PF: > { %s14_s15 = sadd.s32 1, %s5085_s15  }
 0x534   : > { %p11_p4 = scmp.ge.s32.totalorder %s14_s15, 4  }
 0x536   :  { %13 = sbr.rel (!%p11_p4) target bundleno = 1 (0x1), region = 74 }

</bundles_post_ra>
